<compile_context>
chip_gen: v7x
topology: tpu7x:2x2x1
jax: 0.10.0
libtpu: 0.0.40
codegen_flags: <defaults>
</compile_context>

<pallas_src>
import functools

import jax
import jax.numpy as jnp
import numpy as np
from jax.experimental import pallas as pl
from jax.experimental.pallas import tpu as pltpu


def _round_up(v, m):
    return ((v + m - 1) // m) * m


def _vmem_capacity_bytes():
    try:
        return int(pltpu.get_tpu_info().vmem_capacity_bytes)
    except Exception:
        return 64 * 1024 * 1024  # conservative fallback (v7x per-TC VMEM)


# ---------------------------------------------------------------------------
# Fast path: whole encoder in ONE pallas_call (A read once, H1/H2 never
# leave VMEM).  Used when the padded graph fits comfortably in VMEM.
# ---------------------------------------------------------------------------
def _encoder_fused_kernel(a_ref, x_ref, w1_ref, b1_ref, w2_ref, b2_ref,
                          wh_ref, bh_ref, out_ref, *, in_p, mid_p):
    a = a_ref[...]

    def sage(h, w_ref, b_ref, f_in_p, relu):
        # mean aggregation on the MXU, f32 accumulation
        agg = jnp.dot(a, h, preferred_element_type=jnp.float32)
        # two accumulating dots against static halves of [W_l^T ; W_r^T]
        # (no concat intermediate)
        y = jnp.dot(agg.astype(jnp.bfloat16), w_ref[pl.ds(0, f_in_p), :],
                    preferred_element_type=jnp.float32)
        y = y + jnp.dot(h, w_ref[pl.ds(f_in_p, f_in_p), :],
                        preferred_element_type=jnp.float32)
        y = y + b_ref[...]
        if relu:
            y = jnp.maximum(y, 0.0)
        return y

    h1 = sage(x_ref[...], w1_ref, b1_ref, in_p, True).astype(jnp.bfloat16)
    h2 = sage(h1, w2_ref, b2_ref, mid_p, True).astype(jnp.bfloat16)
    out_ref[...] = sage(h2, wh_ref, bh_ref, mid_p, False).astype(out_ref.dtype)


def _encoder_fused(a, x, w1, b1, w2, b2, wh, bh, *, out_dtype, vmem_limit):
    n_p = a.shape[0]
    in_p = x.shape[1]
    mid_p = w1.shape[1]
    head_p = wh.shape[1]

    kernel = functools.partial(_encoder_fused_kernel, in_p=in_p, mid_p=mid_p)

    def const(shape):
        return pl.BlockSpec(shape, lambda i: (0, 0))

    flops = int(2 * n_p * n_p * (in_p + 2 * mid_p)
                + 4 * n_p * (in_p * mid_p + mid_p * mid_p + mid_p * head_p))
    bytes_accessed = int(a.size * 2 + x.size * 2
                         + (w1.size + w2.size + wh.size) * 2
                         + (b1.size + b2.size + bh.size) * 4
                         + n_p * head_p * jnp.dtype(out_dtype).itemsize)

    return pl.pallas_call(
        kernel,
        grid=(1,),
        in_specs=[const(a.shape), const(x.shape),
                  const(w1.shape), const(b1.shape),
                  const(w2.shape), const(b2.shape),
                  const(wh.shape), const(bh.shape)],
        out_specs=const((n_p, head_p)),
        out_shape=jax.ShapeDtypeStruct((n_p, head_p), out_dtype),
        compiler_params=pltpu.CompilerParams(
            dimension_semantics=("arbitrary",),
            vmem_limit_bytes=vmem_limit),
        cost_estimate=pl.CostEstimate(flops=flops, transcendentals=0,
                                      bytes_accessed=bytes_accessed),
    )(a, x, w1, b1, w2, b2, wh, bh)


# ---------------------------------------------------------------------------
# Large-graph path: one SAGE layer, row-tiled ("parallel") and K-tiled over
# the aggregation axis ("arbitrary") with an f32 accumulator in VMEM scratch.
# ---------------------------------------------------------------------------
def _sage_tiled_kernel(a_ref, h_k_ref, h_row_ref, w_ref, b_ref, out_ref,
                       agg_ref, *, f_in_p, apply_relu):
    # a_ref     : (TM, TK)        bf16  row/col tile of normalized adjacency
    # h_k_ref   : (TK, F_in)      bf16  k-block of previous features
    # h_row_ref : (TM, F_in)      bf16  row tile (self term), resident across k
    # w_ref     : (2*F_in, F_out) bf16  [W_l^T ; W_r^T]
    # b_ref     : (1, F_out)      f32
    # agg_ref   : (TM, F_in)      f32   aggregation accumulator (scratch)
    k = pl.program_id(1)

    @pl.when(k == 0)
    def _():
        agg_ref[...] = jnp.zeros_like(agg_ref)

    agg_ref[...] += jnp.dot(a_ref[...], h_k_ref[...],
                            preferred_element_type=jnp.float32)

    @pl.when(k == pl.num_programs(1) - 1)
    def _():
        y = jnp.dot(agg_ref[...].astype(jnp.bfloat16),
                    w_ref[pl.ds(0, f_in_p), :],
                    preferred_element_type=jnp.float32)
        y = y + jnp.dot(h_row_ref[...], w_ref[pl.ds(f_in_p, f_in_p), :],
                        preferred_element_type=jnp.float32)
        y = y + b_ref[...]
        if apply_relu:
            y = jnp.maximum(y, 0.0)
        out_ref[...] = y.astype(out_ref.dtype)


def _a_block_spec(tm, tk):
    index_map = lambda i, k: (i, k)
    if hasattr(pl, "Buffered"):
        try:  # deeper pipelining on the HBM-bound A stream
            return pl.BlockSpec((tm, tk), index_map,
                                pipeline_mode=pl.Buffered(3))
        except TypeError:
            pass
    return pl.BlockSpec((tm, tk), index_map)


def _sage_layer_tiled(a, h, w_cat, b, *, relu, out_dtype, vmem_limit):
    n_p = a.shape[0]
    f_in_p = h.shape[1]
    f_out_p = w_cat.shape[1]

    # >= 2 row steps (both v7x TCs get work); 256 rows fills the 2x256 MXU.
    tm = 256 if n_p >= 512 else max(8, n_p // 2)
    tk = 256
    grid = (n_p // tm, n_p // tk)

    kernel = functools.partial(_sage_tiled_kernel, f_in_p=f_in_p,
                               apply_relu=relu)

    flops = int(2 * n_p * n_p * f_in_p + 4 * n_p * f_in_p * f_out_p)
    bytes_accessed = int(
        a.size * a.dtype.itemsize
        + (grid[0] + 1) * h.size * h.dtype.itemsize
        + w_cat.size * w_cat.dtype.itemsize
        + b.size * b.dtype.itemsize
        + n_p * f_out_p * jnp.dtype(out_dtype).itemsize)

    return pl.pallas_call(
        kernel,
        grid=grid,
        in_specs=[
            _a_block_spec(tm, tk),                              # A tile
            pl.BlockSpec((tk, f_in_p), lambda i, k: (k, 0)),    # H k-block
            pl.BlockSpec((tm, f_in_p), lambda i, k: (i, 0)),    # H row (self)
            pl.BlockSpec((2 * f_in_p, f_out_p), lambda i, k: (0, 0)),
            pl.BlockSpec((1, f_out_p), lambda i, k: (0, 0)),
        ],
        out_specs=pl.BlockSpec((tm, f_out_p), lambda i, k: (i, 0)),
        out_shape=jax.ShapeDtypeStruct((n_p, f_out_p), out_dtype),
        scratch_shapes=[pltpu.VMEM((tm, f_in_p), jnp.float32)],
        compiler_params=pltpu.CompilerParams(
            dimension_semantics=("parallel", "arbitrary"),
            vmem_limit_bytes=vmem_limit),
        cost_estimate=pl.CostEstimate(flops=flops, transcendentals=0,
                                      bytes_accessed=bytes_accessed),
    )(a, h, h, w_cat, b)


# ---------------------------------------------------------------------------
# Encoder wrapper: layout plumbing (dense A_norm, padded/fused bf16 weights).
# ---------------------------------------------------------------------------
def ppi_encoder3(x, edge_index, params, *, force_path=None):
    """x: (N, in_size) f32; edge_index: (2, E) int32 (row0=src, row1=dst)."""
    n, in_size = x.shape
    mid_size = params["wl1"].shape[0]
    out_size = params["wl_mu"].shape[0]

    in_p = _round_up(in_size, 128)
    mid_p = _round_up(mid_size, 128)
    head_p = _round_up(2 * out_size, 128)
    n_p = _round_up(max(n, 256), 256)          # 256-row tiles; padded rows zero

    # dense row-normalized adjacency: A_norm @ h == scatter_mean(src -> dst)
    # (padded rows/cols stay all-zero, so they never influence real rows)
    src, dst = edge_index[0], edge_index[1]
    a = jnp.zeros((n_p, n_p), jnp.float32).at[dst, src].add(1.0)
    a = a / jnp.maximum(a.sum(axis=1, keepdims=True), 1.0)
    a = a.astype(jnp.bfloat16)

    def cat_w(wl, wr, f_in_p, f_out_p):
        f_out, f_in = wl.shape
        w = jnp.zeros((2 * f_in_p, f_out_p), jnp.float32)
        w = w.at[:f_in, :f_out].set(wl.T)                 # agg  -> lin_l
        w = w.at[f_in_p:f_in_p + f_in, :f_out].set(wr.T)  # self -> lin_r
        return w.astype(jnp.bfloat16)

    def pad_b(b, f_out_p):
        out = jnp.zeros((1, f_out_p), jnp.float32)
        return out.at[:, :b.shape[-1]].set(b.reshape(1, -1))

    w1 = cat_w(params["wl1"], params["wr1"], in_p, mid_p)
    b1 = pad_b(params["b1"], mid_p)
    w2 = cat_w(params["wl2"], params["wr2"], mid_p, mid_p)
    b2 = pad_b(params["b2"], mid_p)

    # fused mu|logstd head (lane-dense output, half the head matmuls)
    wh = jnp.zeros((2 * mid_p, head_p), jnp.float32)
    wh = wh.at[:mid_size, :out_size].set(params["wl_mu"].T)
    wh = wh.at[:mid_size, out_size:2 * out_size].set(params["wl_ls"].T)
    wh = wh.at[mid_p:mid_p + mid_size, :out_size].set(params["wr_mu"].T)
    wh = wh.at[mid_p:mid_p + mid_size, out_size:2 * out_size].set(params["wr_ls"].T)
    wh = wh.astype(jnp.bfloat16)
    bh = jnp.zeros((1, head_p), jnp.float32)
    bh = bh.at[:, :out_size].set(params["b_mu"].reshape(1, -1))
    bh = bh.at[:, out_size:2 * out_size].set(params["b_ls"].reshape(1, -1))

    x_p = jnp.zeros((n_p, in_p), jnp.bfloat16).at[:n, :in_size].set(
        x.astype(jnp.bfloat16))

    vmem_cap = _vmem_capacity_bytes()
    vmem_limit = int(vmem_cap * 0.65)

    # conservative VMEM estimate for the single-call fused path
    fused_est = (n_p * n_p * 2 + n_p * in_p * 2
                 + (w1.size + w2.size + wh.size) * 2
                 + n_p * head_p * 4
                 + n_p * (in_p + 2 * mid_p + head_p) * 4 * 2)
    use_fused = (force_path == "fused"
                 or (force_path is None and fused_est <= int(0.4 * vmem_cap)))

    if use_fused:
        heads = _encoder_fused(a, x_p, w1, b1, w2, b2, wh, bh,
                               out_dtype=jnp.float32, vmem_limit=vmem_limit)
    else:
        h1 = _sage_layer_tiled(a, x_p, w1, b1, relu=True,
                               out_dtype=jnp.bfloat16, vmem_limit=vmem_limit)
        h2 = _sage_layer_tiled(a, h1, w2, b2, relu=True,
                               out_dtype=jnp.bfloat16, vmem_limit=vmem_limit)
        heads = _sage_layer_tiled(a, h2, wh, bh, relu=False,
                                  out_dtype=jnp.float32, vmem_limit=vmem_limit)

    mu = heads[:n, :out_size]
    logstd = heads[:n, out_size:2 * out_size]
    return mu, logstd


# ---------------------------------------------------------------------------
# Params / reference / test
# ---------------------------------------------------------------------------
def _init_params(key, in_size, mid_size, out_size):
    ks = jax.random.split(key, 8)

    def lin(k, fan_out, fan_in):
        s = 1.0 / np.sqrt(fan_in)
        return jax.random.uniform(k, (fan_out, fan_in), jnp.float32, -s, s)

    return {
        "wl1": lin(ks[0], mid_size, in_size),
        "wr1": lin(ks[1], mid_size, in_size),
        "b1": jnp.zeros((1, mid_size), jnp.float32),
        "wl2": lin(ks[2], mid_size, mid_size),
        "wr2": lin(ks[3], mid_size, mid_size),
        "b2": jnp.zeros((1, mid_size), jnp.float32),
        "wl_mu": lin(ks[4], out_size, mid_size),
        "wr_mu": lin(ks[5], out_size, mid_size),
        "b_mu": jnp.zeros((1, out_size), jnp.float32),
        "wl_ls": lin(ks[6], out_size, mid_size),
        "wr_ls": lin(ks[7], out_size, mid_size),
        "b_ls": jnp.zeros((1, out_size), jnp.float32),
    }


def _reference(x, edge_index, params):
    # pure-JAX f32 reference with identical semantics (PyG SAGEConv mean aggr)
    n = x.shape[0]
    src, dst = edge_index[0], edge_index[1]
    a = jnp.zeros((n, n), jnp.float32).at[dst, src].add(1.0)
    a = a / jnp.maximum(a.sum(axis=1, keepdims=True), 1.0)

    def sage(h, wl, wr, b):
        return (a @ h) @ wl.T + h @ wr.T + b

    h1 = jax.nn.relu(sage(x, params["wl1"], params["wr1"], params["b1"]))
    h2 = jax.nn.relu(sage(h1, params["wl2"], params["wr2"], params["b2"]))
    mu = sage(h2, params["wl_mu"], params["wr_mu"], params["b_mu"])
    ls = sage(h2, params["wl_ls"], params["wr_ls"], params["b_ls"])
    return mu, ls


if __name__ == "__main__":
    key = jax.random.PRNGKey(0)
    k_x, k_e, k_p = jax.random.split(key, 3)

    N, E = 128, 512
    in_size, mid_size, out_size = 64, 64, 32

    x = jax.random.normal(k_x, (N, in_size), jnp.float32)
    edge_index = jax.random.randint(k_e, (2, E), 0, N, jnp.int32)
    params = _init_params(k_p, in_size, mid_size, out_size)

    mu_ref, ls_ref = _reference(x, edge_index, params)

    def check(got, ref, tag):
        got = np.asarray(got)
        ref = np.asarray(ref)
        assert np.allclose(got, ref, atol=5e-2, rtol=5e-2), (
            tag, float(np.max(np.abs(got - ref))))

    # default path: single fused kernel (small graphs)
    mu, logstd = ppi_encoder3(x, edge_index, params)
    jax.block_until_ready((mu, logstd))
    check(mu, mu_ref, "fused-mu")
    check(logstd, ls_ref, "fused-logstd")

    # also exercise the row/K-tiled per-layer path used for large graphs
    mu_t, ls_t = ppi_encoder3(x, edge_index, params, force_path="tiled")
    jax.block_until_ready((mu_t, ls_t))
    check(mu_t, mu_ref, "tiled-mu")
    check(ls_t, ls_ref, "tiled-logstd")

    print("KERNEL_OK")
</pallas_src>

<mosaic_0001>
module attributes {stable_mosaic.version = 11 : i64} {
  func.func @_encoder_fused_kernel(%arg0: i32, %arg1: memref<256x256xbf16, #tpu.memory_space<vmem>>, %arg2: memref<256x128xbf16, #tpu.memory_space<vmem>>, %arg3: memref<256x128xbf16, #tpu.memory_space<vmem>>, %arg4: memref<1x128xf32, #tpu.memory_space<vmem>>, %arg5: memref<256x128xbf16, #tpu.memory_space<vmem>>, %arg6: memref<1x128xf32, #tpu.memory_space<vmem>>, %arg7: memref<256x128xbf16, #tpu.memory_space<vmem>>, %arg8: memref<1x128xf32, #tpu.memory_space<vmem>>, %arg9: memref<256x128xf32, #tpu.memory_space<vmem>>) attributes {dimension_semantics = [#tpu.dimension_semantics<arbitrary>], iteration_bounds = array<i64: 1>, scalar_prefetch = 0 : i64, scratch_operands = 0 : i64, tpu.core_type = #tpu.core_type<tc>, window_params = [{pipeline_mode = #tpu.pipeline_mode<synchronous>, transform_indices = @transform_0, window_bounds = array<i64: 256, 256>}, {pipeline_mode = #tpu.pipeline_mode<synchronous>, transform_indices = @transform_1, window_bounds = array<i64: 256, 128>}, {pipeline_mode = #tpu.pipeline_mode<synchronous>, transform_indices = @transform_2, window_bounds = array<i64: 256, 128>}, {pipeline_mode = #tpu.pipeline_mode<synchronous>, transform_indices = @transform_3, window_bounds = array<i64: 1, 128>}, {pipeline_mode = #tpu.pipeline_mode<synchronous>, transform_indices = @transform_4, window_bounds = array<i64: 256, 128>}, {pipeline_mode = #tpu.pipeline_mode<synchronous>, transform_indices = @transform_5, window_bounds = array<i64: 1, 128>}, {pipeline_mode = #tpu.pipeline_mode<synchronous>, transform_indices = @transform_6, window_bounds = array<i64: 256, 128>}, {pipeline_mode = #tpu.pipeline_mode<synchronous>, transform_indices = @transform_7, window_bounds = array<i64: 1, 128>}, {pipeline_mode = #tpu.pipeline_mode<synchronous>, transform_indices = @transform_8, window_bounds = array<i64: 256, 128>}]} {
    %c0 = arith.constant 0 : index
    %c0_0 = arith.constant 0 : index
    %0 = vector.load %arg1[%c0, %c0_0] : memref<256x256xbf16, #tpu.memory_space<vmem>>, vector<256x256xbf16>
    %c0_1 = arith.constant 0 : index
    %c0_2 = arith.constant 0 : index
    %1 = vector.load %arg2[%c0_1, %c0_2] : memref<256x128xbf16, #tpu.memory_space<vmem>>, vector<256x128xbf16>
    %cst = arith.constant dense<0.000000e+00> : vector<256x128xf32>
    %2 = tpu.matmul %0, %1, %cst {dimension_numbers = #tpu.dot_dimension_numbers<[1], [0], [0], [1], [0, 0, 1, 1], [], []>} : vector<256x256xbf16>, vector<256x128xbf16>, vector<256x128xf32> -> vector<256x128xf32>
    %3 = arith.truncf %2 : vector<256x128xf32> to vector<256x128xbf16>
    %c0_3 = arith.constant 0 : index
    %c0_4 = arith.constant 0 : index
    %4 = vector.load %arg3[%c0_3, %c0_4] : memref<256x128xbf16, #tpu.memory_space<vmem>>, vector<128x128xbf16>
    %cst_5 = arith.constant dense<0.000000e+00> : vector<256x128xf32>
    %5 = tpu.matmul %3, %4, %cst_5 {dimension_numbers = #tpu.dot_dimension_numbers<[1], [0], [0], [1], [0, 0, 1, 1], [], []>} : vector<256x128xbf16>, vector<128x128xbf16>, vector<256x128xf32> -> vector<256x128xf32>
    %c128 = arith.constant 128 : index
    %c0_6 = arith.constant 0 : index
    %6 = vector.load %arg3[%c128, %c0_6] : memref<256x128xbf16, #tpu.memory_space<vmem>>, vector<128x128xbf16>
    %cst_7 = arith.constant dense<0.000000e+00> : vector<256x128xf32>
    %7 = tpu.matmul %1, %6, %cst_7 {dimension_numbers = #tpu.dot_dimension_numbers<[1], [0], [0], [1], [0, 0, 1, 1], [], []>} : vector<256x128xbf16>, vector<128x128xbf16>, vector<256x128xf32> -> vector<256x128xf32>
    %8 = arith.addf %5, %7 : vector<256x128xf32>
    %c0_8 = arith.constant 0 : index
    %c0_9 = arith.constant 0 : index
    %9 = vector.load %arg4[%c0_8, %c0_9] : memref<1x128xf32, #tpu.memory_space<vmem>>, vector<1x128xf32>
    %10 = vector.broadcast %9 : vector<1x128xf32> to vector<256x128xf32>
    %11 = arith.addf %8, %10 : vector<256x128xf32>
    %cst_10 = arith.constant 0.000000e+00 : f32
    %12 = vector.broadcast %cst_10 : f32 to vector<256x128xf32>
    %13 = arith.maximumf %11, %12 : vector<256x128xf32>
    %14 = arith.truncf %13 : vector<256x128xf32> to vector<256x128xbf16>
    %cst_11 = arith.constant dense<0.000000e+00> : vector<256x128xf32>
    %15 = tpu.matmul %0, %14, %cst_11 {dimension_numbers = #tpu.dot_dimension_numbers<[1], [0], [0], [1], [0, 0, 1, 1], [], []>} : vector<256x256xbf16>, vector<256x128xbf16>, vector<256x128xf32> -> vector<256x128xf32>
    %16 = arith.truncf %15 : vector<256x128xf32> to vector<256x128xbf16>
    %c0_12 = arith.constant 0 : index
    %c0_13 = arith.constant 0 : index
    %17 = vector.load %arg5[%c0_12, %c0_13] : memref<256x128xbf16, #tpu.memory_space<vmem>>, vector<128x128xbf16>
    %cst_14 = arith.constant dense<0.000000e+00> : vector<256x128xf32>
    %18 = tpu.matmul %16, %17, %cst_14 {dimension_numbers = #tpu.dot_dimension_numbers<[1], [0], [0], [1], [0, 0, 1, 1], [], []>} : vector<256x128xbf16>, vector<128x128xbf16>, vector<256x128xf32> -> vector<256x128xf32>
    %c128_15 = arith.constant 128 : index
    %c0_16 = arith.constant 0 : index
    %19 = vector.load %arg5[%c128_15, %c0_16] : memref<256x128xbf16, #tpu.memory_space<vmem>>, vector<128x128xbf16>
    %cst_17 = arith.constant dense<0.000000e+00> : vector<256x128xf32>
    %20 = tpu.matmul %14, %19, %cst_17 {dimension_numbers = #tpu.dot_dimension_numbers<[1], [0], [0], [1], [0, 0, 1, 1], [], []>} : vector<256x128xbf16>, vector<128x128xbf16>, vector<256x128xf32> -> vector<256x128xf32>
    %21 = arith.addf %18, %20 : vector<256x128xf32>
    %c0_18 = arith.constant 0 : index
    %c0_19 = arith.constant 0 : index
    %22 = vector.load %arg6[%c0_18, %c0_19] : memref<1x128xf32, #tpu.memory_space<vmem>>, vector<1x128xf32>
    %23 = vector.broadcast %22 : vector<1x128xf32> to vector<256x128xf32>
    %24 = arith.addf %21, %23 : vector<256x128xf32>
    %cst_20 = arith.constant 0.000000e+00 : f32
    %25 = vector.broadcast %cst_20 : f32 to vector<256x128xf32>
    %26 = arith.maximumf %24, %25 : vector<256x128xf32>
    %27 = arith.truncf %26 : vector<256x128xf32> to vector<256x128xbf16>
    %cst_21 = arith.constant dense<0.000000e+00> : vector<256x128xf32>
    %28 = tpu.matmul %0, %27, %cst_21 {dimension_numbers = #tpu.dot_dimension_numbers<[1], [0], [0], [1], [0, 0, 1, 1], [], []>} : vector<256x256xbf16>, vector<256x128xbf16>, vector<256x128xf32> -> vector<256x128xf32>
    %29 = arith.truncf %28 : vector<256x128xf32> to vector<256x128xbf16>
    %c0_22 = arith.constant 0 : index
    %c0_23 = arith.constant 0 : index
    %30 = vector.load %arg7[%c0_22, %c0_23] : memref<256x128xbf16, #tpu.memory_space<vmem>>, vector<128x128xbf16>
    %cst_24 = arith.constant dense<0.000000e+00> : vector<256x128xf32>
    %31 = tpu.matmul %29, %30, %cst_24 {dimension_numbers = #tpu.dot_dimension_numbers<[1], [0], [0], [1], [0, 0, 1, 1], [], []>} : vector<256x128xbf16>, vector<128x128xbf16>, vector<256x128xf32> -> vector<256x128xf32>
    %c128_25 = arith.constant 128 : index
    %c0_26 = arith.constant 0 : index
    %32 = vector.load %arg7[%c128_25, %c0_26] : memref<256x128xbf16, #tpu.memory_space<vmem>>, vector<128x128xbf16>
    %cst_27 = arith.constant dense<0.000000e+00> : vector<256x128xf32>
    %33 = tpu.matmul %27, %32, %cst_27 {dimension_numbers = #tpu.dot_dimension_numbers<[1], [0], [0], [1], [0, 0, 1, 1], [], []>} : vector<256x128xbf16>, vector<128x128xbf16>, vector<256x128xf32> -> vector<256x128xf32>
    %34 = arith.addf %31, %33 : vector<256x128xf32>
    %c0_28 = arith.constant 0 : index
    %c0_29 = arith.constant 0 : index
    %35 = vector.load %arg8[%c0_28, %c0_29] : memref<1x128xf32, #tpu.memory_space<vmem>>, vector<1x128xf32>
    %36 = vector.broadcast %35 : vector<1x128xf32> to vector<256x128xf32>
    %37 = arith.addf %34, %36 : vector<256x128xf32>
    %c0_30 = arith.constant 0 : index
    %c0_31 = arith.constant 0 : index
    %38 = vector.load %arg9[%c0_30, %c0_31] : memref<256x128xf32, #tpu.memory_space<vmem>>, vector<256x128xf32>
    tpu.vector_store %arg9[%c0_30, %c0_31], %37 {strides = array<i32>} : memref<256x128xf32, #tpu.memory_space<vmem>>, vector<256x128xf32>,
    return
  }
  func.func @transform_0(%arg0: i32) -> (i32, i32) {
    %c0_i32 = arith.constant 0 : i32
    %c0_i32_0 = arith.constant 0 : i32
    %c0_i32_1 = arith.constant 0 : i32
    return %c0_i32, %c0_i32_0 : i32, i32
  }
  func.func @transform_1(%arg0: i32) -> (i32, i32) {
    %c0_i32 = arith.constant 0 : i32
    %c0_i32_0 = arith.constant 0 : i32
    %c0_i32_1 = arith.constant 0 : i32
    return %c0_i32, %c0_i32_0 : i32, i32
  }
  func.func @transform_2(%arg0: i32) -> (i32, i32) {
    %c0_i32 = arith.constant 0 : i32
    %c0_i32_0 = arith.constant 0 : i32
    %c0_i32_1 = arith.constant 0 : i32
    return %c0_i32, %c0_i32_0 : i32, i32
  }
  func.func @transform_3(%arg0: i32) -> (i32, i32) {
    %c0_i32 = arith.constant 0 : i32
    %c0_i32_0 = arith.constant 0 : i32
    %c0_i32_1 = arith.constant 0 : i32
    return %c0_i32, %c0_i32_0 : i32, i32
  }
  func.func @transform_4(%arg0: i32) -> (i32, i32) {
    %c0_i32 = arith.constant 0 : i32
    %c0_i32_0 = arith.constant 0 : i32
    %c0_i32_1 = arith.constant 0 : i32
    return %c0_i32, %c0_i32_0 : i32, i32
  }
  func.func @transform_5(%arg0: i32) -> (i32, i32) {
    %c0_i32 = arith.constant 0 : i32
    %c0_i32_0 = arith.constant 0 : i32
    %c0_i32_1 = arith.constant 0 : i32
    return %c0_i32, %c0_i32_0 : i32, i32
  }
  func.func @transform_6(%arg0: i32) -> (i32, i32) {
    %c0_i32 = arith.constant 0 : i32
    %c0_i32_0 = arith.constant 0 : i32
    %c0_i32_1 = arith.constant 0 : i32
    return %c0_i32, %c0_i32_0 : i32, i32
  }
  func.func @transform_7(%arg0: i32) -> (i32, i32) {
    %c0_i32 = arith.constant 0 : i32
    %c0_i32_0 = arith.constant 0 : i32
    %c0_i32_1 = arith.constant 0 : i32
    return %c0_i32, %c0_i32_0 : i32, i32
  }
  func.func @transform_8(%arg0: i32) -> (i32, i32) {
    %c0_i32 = arith.constant 0 : i32
    %c0_i32_0 = arith.constant 0 : i32
    %c0_i32_1 = arith.constant 0 : i32
    return %c0_i32, %c0_i32_0 : i32, i32
  }
}

</mosaic_0001>

<bundles_post_ra>
// kernel: tpu_custom_call.1
= control target key start
LH: loop header
LB: loop body
LE: loop exit
PB: predicated region body
PF: predicated region fallthrough
CT: control target
= control target key end

     0   :  { %13 = vsyncpa [#allocation3], 0  ;;  %s4329_s0 = inlined_call_operand.hbm [shape: bf16[256,256], index: 0, kind: input, shape index: {}]   ;;  %s4330_s1 = inlined_call_operand.hbm [shape: bf16[256,128], index: 1, kind: input, shape index: {}]   ;;  %s4331_s2 = inlined_call_operand.hbm [shape: bf16[256,128], index: 2, kind: input, shape index: {}]   ;;  %s4332_s3 = inlined_call_operand.vmem [shape: f32[1,128], index: 3, kind: input, shape index: {}]   ;;  %s4333_s4 = inlined_call_operand.hbm [shape: bf16[256,128], index: 4, kind: input, shape index: {}]   ;;  %s4334_s5 = inlined_call_operand.vmem [shape: f32[1,128], index: 5, kind: input, shape index: {}]   ;;  %s4335_s6 = inlined_call_operand.hbm [shape: bf16[256,128], index: 6, kind: input, shape index: {}]   ;;  %s4336_s7 = inlined_call_operand.vmem [shape: f32[1,128], index: 7, kind: input, shape index: {}]   ;;  %s4337_s8 = inlined_call_operand.hbm [shape: f32[256,128], index: 8, kind: output, shape index: {}]  }
   0x1   :  { %14 = vsyncpa [#allocation6], 0 }
   0x2   :  { %15 = vsyncpa [#allocation9], 0 }
   0x3   :  { %16 = vsyncpa [#allocation4], 0  ;;  %s3821_s27 = smov [#allocation5]   ;;  %s3681_s9 = scalar_lea.hbm %s4330_s1, 2048 }
   0x4   :  { %s34_s28 = sshll.u32 %s3821_s27, 4  ;;  %p3682_p0 = scmp.ne.s32.totalorder %s4330_s1, %s3681_s9  ;;  %s35_s28 = int_to_ptr.vmem [resolvable:$true] %s34_s28 }
   0x5   :  { %p3685_p1 = scmp.lt.u32.totalorder %s3681_s9, %s4330_s1 }
   0x7   :  { %p3687_p2 = pnand %p3685_p1, %p3682_p0 }
   0x9   :  { %3690 = shalt.err (!%p3687_p2)
}
   0xa   :  { %s3691_s14 = scalar_lea.vmem %s35_s28, 2048  ;;  %p3696_p4 = scmp.lt.s32.totalorder %s35_s28, %s35_s28 }
   0xb   :  { %p3692_p3 = scmp.ne.s32.totalorder %s35_s28, %s3691_s14  ;;  %p3697_p5 = scmp.lt.s32.totalorder %s3691_s14, %s3691_s14 }
   0xd   :  { %p3698_p6 = por %p3697_p5, %p3696_p4 }
   0xf   :  { %p3699_p7 = pnand %p3698_p6, %p3692_p3 }
  0x11   :  { %3702 = shalt.err (!%p3699_p7)
}
  0x12   :  { %s3822_s15 = smov 64   ;;  %s3823_s16 = smov 4  }
  0x13   :  { %40 = dma.hbm_to_vmem [thread:$0]  %s4330_s1, 2048, %s35_s28, [#allocation6], %s3822_s15, %s3822_s15, %s3823_s16  }
  0x14   :  { %s3824_s19 = smov [#allocation8]   ;;  %s3825_s21 = smov [#allocation2]  }
  0x15   :  { %s60_s20 = sshll.u32 %s3824_s19, 4  ;;  %s22_s22 = sshll.u32 %s3825_s21, 4  ;;  %s61_s20 = int_to_ptr.vmem [resolvable:$true] %s60_s20  ;;  %s23_s22 = int_to_ptr.vmem [resolvable:$true] %s22_s22 }
  0x16   :  { %s3703_s25 = scalar_lea.hbm %s4333_s4, 2048 }
  0x17   :  { %p3704_p8 = scmp.ne.s32.totalorder %s4333_s4, %s3703_s25  ;;  %p3707_p9 = scmp.lt.u32.totalorder %s3703_s25, %s4333_s4 }
  0x19   :  { %p3709_p10 = pnand %p3707_p9, %p3704_p8 }
  0x1b   :  { %3712 = shalt.err (!%p3709_p10)
}
  0x1c   :  { %s3713_s1 = scalar_lea.vmem %s61_s20, 2048  ;;  %p3718_p12 = scmp.lt.s32.totalorder %s61_s20, %s61_s20 }
  0x1d   :  { %p3714_p11 = scmp.ne.s32.totalorder %s61_s20, %s3713_s1  ;;  %p3719_p13 = scmp.lt.s32.totalorder %s3713_s1, %s3713_s1 }
  0x1f   :  { %p3720_p0 = por %p3719_p13, %p3718_p12 }
  0x21   :  { %p3721_p1 = pnand %p3720_p0, %p3714_p11 }
  0x23   :  { %3724 = shalt.err (!%p3721_p1)
}
  0x24   :  { %66 = dma.hbm_to_vmem [thread:$0]  %s4333_s4, 2048, %s61_s20, [#allocation9], %s3822_s15, %s3822_s15, %s3823_s16  }
  0x25   :  { %s3725_s12 = scalar_lea.hbm %s4329_s0, 4096 }
  0x26   :  { %p3726_p2 = scmp.ne.s32.totalorder %s4329_s0, %s3725_s12  ;;  %p3729_p3 = scmp.lt.u32.totalorder %s3725_s12, %s4329_s0 }
  0x28   :  { %p3731_p4 = pnand %p3729_p3, %p3726_p2 }
  0x2a   :  { %3734 = shalt.err (!%p3731_p4)
}
  0x2b   :  { %s3735_s19 = scalar_lea.vmem %s23_s22, 4096  ;;  %p3740_p6 = scmp.lt.s32.totalorder %s23_s22, %s23_s22 }
  0x2c   :  { %p3736_p5 = scmp.ne.s32.totalorder %s23_s22, %s3735_s19  ;;  %p3741_p7 = scmp.lt.s32.totalorder %s3735_s19, %s3735_s19 }
  0x2e   :  { %p3742_p8 = por %p3741_p7, %p3740_p6 }
  0x30   :  { %p3743_p9 = pnand %p3742_p8, %p3736_p5 }
  0x32   :  { %3746 = shalt.err (!%p3743_p9)
}
  0x33   :  { %s3826_s4 = smov 128   ;;  %s3827_s20 = smov 8  }
  0x34   :  { %28 = dma.hbm_to_vmem [thread:$0]  %s4329_s0, 4096, %s23_s22, [#allocation3], %s3826_s4, %s3826_s4, %s3827_s20  }
  0x35   :  { %s3828_s24 = smov [#allocation7]   ;;  %s3829_s26 = smov [#allocation10]  }
  0x36   :  { %s46_s25 = sshll.u32 %s3828_s24, 4  ;;  %s74_s27 = sshll.u32 %s3829_s26, 4  ;;  %s47_s25 = int_to_ptr.vmem [resolvable:$true] %s46_s25  ;;  %s75_s27 = int_to_ptr.vmem [resolvable:$true] %s74_s27 }
  0x37   :  { %s3747_s1 = scalar_lea.hbm %s4331_s2, 2048 }
  0x38   :  { %p3748_p10 = scmp.ne.s32.totalorder %s4331_s2, %s3747_s1  ;;  %p3751_p11 = scmp.lt.u32.totalorder %s3747_s1, %s4331_s2 }
  0x3a   :  { %p3753_p12 = pnand %p3751_p11, %p3748_p10 }
  0x3c   :  { %3756 = shalt.err (!%p3753_p12)
}
  0x3d   :  { %s3757_s0 = scalar_lea.vmem %s47_s25, 2048  ;;  %p3762_p0 = scmp.lt.s32.totalorder %s47_s25, %s47_s25 }
  0x3e   :  { %p3758_p13 = scmp.ne.s32.totalorder %s47_s25, %s3757_s0  ;;  %p3763_p1 = scmp.lt.s32.totalorder %s3757_s0, %s3757_s0 }
  0x40   :  { %p3764_p2 = por %p3763_p1, %p3762_p0 }
  0x42   :  { %p3765_p3 = pnand %p3764_p2, %p3758_p13 }
  0x44   :  { %3768 = shalt.err (!%p3765_p3)
}
  0x45   :  { %52 = dma.hbm_to_vmem [thread:$0]  %s4331_s2, 2048, %s47_s25, [#allocation6], %s3822_s15, %s3822_s15, %s3823_s16  }
  0x46   :  { %s3769_s17 = scalar_lea.hbm %s4335_s6, 2048 }
  0x47   :  { %p3770_p4 = scmp.ne.s32.totalorder %s4335_s6, %s3769_s17  ;;  %p3773_p5 = scmp.lt.u32.totalorder %s3769_s17, %s4335_s6 }
  0x49   :  { %p3775_p6 = pnand %p3773_p5, %p3770_p4 }
  0x4b   :  { %3778 = shalt.err (!%p3775_p6)
}
  0x4c   :  { %s3779_s24 = scalar_lea.vmem %s75_s27, 2048  ;;  %p3784_p8 = scmp.lt.s32.totalorder %s75_s27, %s75_s27 }
  0x4d   :  { %p3780_p7 = scmp.ne.s32.totalorder %s75_s27, %s3779_s24  ;;  %p3785_p9 = scmp.lt.s32.totalorder %s3779_s24, %s3779_s24 }
  0x4f   :  { %p3786_p10 = por %p3785_p9, %p3784_p8 }
  0x51   :  { %p3787_p11 = pnand %p3786_p10, %p3780_p7 }
  0x53   :  { %3790 = shalt.err (!%p3787_p11)
}
  0x54   :  { %80 = dma.hbm_to_vmem [thread:$0]  %s4335_s6, 2048, %s75_s27, [#allocation9], %s3822_s15, %s3822_s15, %s3823_s16  }
  0x55   :  { %3813 = dma.done.wait [#allocation3], 4096  }
  0x56   :  { %3814 = vsyncadd [#allocation3], 4294963200 }
  0x57   :  { %3815 = dma.done.wait [#allocation6], 4096  }
  0x58   :  { %3816 = vsyncadd [#allocation6], 4294963200 }
  0x59   :  { %3817 = dma.done.wait [#allocation9], 4096  }
  0x5a   :  { %3818 = vsyncadd [#allocation9], 4294963200  ;;  %v3951_v0 = vld [vmem:[#allocation5 + $0x40] sm:$0xff]   ;;  %v3954_v2 = vld [vmem:[#allocation5 + $0x48] sm:$0xff]  }
  0x5b   :  { %v3538_v1 = vld [vmem:[#allocation5] sm:$0xff]   ;;  %2663 = vmatprep.subr.bf16.mxu0 %v3951_v0  ;;  %v3956_v3 = vld [vmem:[#allocation5 + $0x8] sm:$0xff]   ;;  %v3959_v4 = vld [vmem:[#allocation5 + $0x50] sm:$0xff]  }
  0x5c   :  { %2664 = vmatpush3.bf16.msra.mxu0 %v3538_v1  ;;  %3159 = vmatprep.mubr.bf16.mxu1 %v3538_v1  ;;  %v3962_v5 = vld [vmem:[#allocation5 + $0x10] sm:$0xff]   ;;  %v3965_v6 = vld [vmem:[#allocation5 + $0x58] sm:$0xff]   ;;  %v3971_v8 = vld [vmem:[#allocation5 + $0x60] sm:$0xff]  }
  0x5d   :  { %2665 = vmatprep.subr.bf16.mxu0 %v3954_v2  ;;  %v3968_v7 = vld [vmem:[#allocation5 + $0x18] sm:$0xff]   ;;  %v3973_v9 = vld [vmem:[#allocation5 + $0x20] sm:$0xff]   ;;  %v3976_v10 = vld [vmem:[#allocation5 + $0x68] sm:$0xff]  }
  0x5e   :  { %v3979_v11 = vld [vmem:[#allocation2 + $0x4] ss:$8 sps:$4 sm:$0xff]   ;;  %v3986_v13 = vld [vmem:[#allocation5 + $0x70] sm:$0xff]   ;;  %v3992_v15 = vld [vmem:[#allocation5 + $0x78] sm:$0xff]  }
  0x5f   :  { %451 = vmatprep.mubr.bf16.mxu0 %v3979_v11  ;;  %v3983_v12 = vld [vmem:[#allocation5 + $0x28] sm:$0xff]   ;;  %v3989_v14 = vld [vmem:[#allocation5 + $0x30] sm:$0xff]   ;;  %v3995_v16 = vld [vmem:[#allocation5 + $0x38] sm:$0xff]  }
  0x60   :  { %2666 = vmatpush3.bf16.msra.mxu0 %v3956_v3  ;;  %v3555_v17 = vld [vmem:[#allocation2] ss:$8 sps:$4 sm:$0xff]   ;;  %v3556_v18 = vld [vmem:[#allocation2 + $0x14] ss:$8 sps:$4 sm:$0xff]   ;;  %v3558_v19 = vld [vmem:[#allocation2 + $0x10] ss:$8 sps:$4 sm:$0xff]  }
  0x61   :  { %2667 = vmatprep.subr.bf16.mxu0 %v3959_v4  ;;  %v3559_v20 = vld [vmem:[#allocation2 + $0x24] ss:$8 sps:$4 sm:$0xff]   ;;  %v3603_v23 = vld [vmem:[#allocation7 + $0x50] sm:$0xff]   ;;  %v3999_v24 = vld [vmem:[#allocation2 + $0x20] ss:$8 sps:$4 sm:$0xff]  }
  0x62   :  { %v3601_v21 = vld [vmem:[#allocation7 + $0x40] sm:$0xff]   ;;  %v3602_v22 = vld [vmem:[#allocation7 + $0x48] sm:$0xff]   ;;  %v3604_v25 = vld [vmem:[#allocation7 + $0x58] sm:$0xff]  }
  0x63   :  { %3143 = vmatprep.subr.bf16.mxu1 %v3601_v21  ;;  %v4001_v26 = vld [vmem:[#allocation2 + $0x34] ss:$8 sps:$4 sm:$0xff]   ;;  %v3605_v27 = vld [vmem:[#allocation7 + $0x60] sm:$0xff]   ;;  %v4005_v28 = vld [vmem:[#allocation2 + $0x30] ss:$8 sps:$4 sm:$0xff]  }
  0x64   :  { %2668 = vmatpush3.bf16.msra.mxu0 %v3962_v5  ;;  %3144 = vmatpush3.bf16.msra.mxu1 %v3601_v21  ;;  %v3606_v29 = vld [vmem:[#allocation7 + $0x68] sm:$0xff]   ;;  %v3607_v31 = vld [vmem:[#allocation7 + $0x70] sm:$0xff]   ;;  %v3608_v33 = vld [vmem:[#allocation7 + $0x78] sm:$0xff]  }
  0x65   :  { %2669 = vmatprep.subr.bf16.mxu0 %v3965_v6  ;;  %3145 = vmatprep.subr.bf16.mxu1 %v3602_v22  ;;  %v4007_v30 = vld [vmem:[#allocation2 + $0x44] ss:$8 sps:$4 sm:$0xff]   ;;  %v4011_v32 = vld [vmem:[#allocation2 + $0x40] ss:$8 sps:$4 sm:$0xff]   ;;  %v4013_v34 = vld [vmem:[#allocation2 + $0x54] ss:$8 sps:$4 sm:$0xff]  }
  0x66   :  { %v3609_v35 = vld [vmem:[#allocation7] sm:$0xff]   ;;  %v4017_v36 = vld [vmem:[#allocation2 + $0x50] ss:$8 sps:$4 sm:$0xff]   ;;  %v3610_v37 = vld [vmem:[#allocation7 + $0x8] sm:$0xff]  }
  0x67   :  { %v4019_v38 = vld [vmem:[#allocation2 + $0x64] ss:$8 sps:$4 sm:$0xff]   ;;  %v3611_v39 = vld [vmem:[#allocation7 + $0x10] sm:$0xff]   ;;  %v4025_v40 = vld [vmem:[#allocation2 + $0x60] ss:$8 sps:$4 sm:$0xff]  }
  0x68   :  { %2670 = vmatpush3.bf16.msra.mxu0 %v3968_v7  ;;  %3146 = vmatpush3.bf16.msra.mxu1 %v3602_v22  ;;  %v3612_v41 = vld [vmem:[#allocation7 + $0x18] sm:$0xff]   ;;  %v4035_v44 = vld [vmem:[#allocation2 + $0x84] ss:$8 sps:$4 sm:$0xff]   ;;  %v4041_v45 = vld [vmem:[#allocation2 + $0x80] ss:$8 sps:$4 sm:$0xff]  }
  0x69   :  { %2671 = vmatprep.subr.bf16.mxu0 %v3971_v8  ;;  %3147 = vmatprep.subr.bf16.mxu1 %v3603_v23  ;;  %v4027_v42 = vld [vmem:[#allocation2 + $0x74] ss:$8 sps:$4 sm:$0xff]   ;;  %v4033_v43 = vld [vmem:[#allocation2 + $0x70] ss:$8 sps:$4 sm:$0xff]   ;;  %v4051_v48 = vld [vmem:[#allocation2 + $0xa4] ss:$8 sps:$4 sm:$0xff]  }
  0x6a   :  { %v4043_v46 = vld [vmem:[#allocation2 + $0x94] ss:$8 sps:$4 sm:$0xff]   ;;  %v4049_v47 = vld [vmem:[#allocation2 + $0x90] ss:$8 sps:$4 sm:$0xff]   ;;  %v4057_v49 = vld [vmem:[#allocation2 + $0xa0] ss:$8 sps:$4 sm:$0xff]  }
  0x6b   :  { %v4059_v50 = vld [vmem:[#allocation2 + $0xb4] ss:$8 sps:$4 sm:$0xff]   ;;  %v3613_v51 = vld [vmem:[#allocation7 + $0x20] sm:$0xff]   ;;  %v4065_v52 = vld [vmem:[#allocation2 + $0xb0] ss:$8 sps:$4 sm:$0xff]  }
  0x6c   :  { %2672 = vmatpush3.bf16.msra.mxu0 %v3973_v9  ;;  %3148 = vmatpush3.bf16.msra.mxu1 %v3603_v23  ;;  %v4067_v53 = vld [vmem:[#allocation2 + $0xc4] ss:$8 sps:$4 sm:$0xff]   ;;  %v3615_v55 = vld [vmem:[#allocation7 + $0x30] sm:$0xff]   ;;  %v4073_v56 = vld [vmem:[#allocation2 + $0xc0] ss:$8 sps:$4 sm:$0xff]  }
  0x6d   :  { %2673 = vmatprep.subr.bf16.mxu0 %v3976_v10  ;;  %3149 = vmatprep.subr.bf16.mxu1 %v3604_v25  ;;  %v3614_v54 = vld [vmem:[#allocation7 + $0x28] sm:$0xff]   ;;  %v4075_v57 = vld [vmem:[#allocation2 + $0xd4] ss:$8 sps:$4 sm:$0xff]   ;;  %v4080_v59 = vld [vmem:[#allocation2 + $0xd0] ss:$8 sps:$4 sm:$0xff]  }
  0x6e   :  { %v3616_v58 = vld [vmem:[#allocation7 + $0x38] sm:$0xff]   ;;  %v4082_v60 = vld [vmem:[#allocation2 + $0xe4] ss:$8 sps:$4 sm:$0xff]   ;;  %v4086_v61 = vld [vmem:[#allocation2 + $0xe0] ss:$8 sps:$4 sm:$0xff]  }
  0x6f   :  { %v4088_v62 = vld [vmem:[#allocation2 + $0xf4] ss:$8 sps:$4 sm:$0xff]   ;;  %v4092_v63 = vld [vmem:[#allocation2 + $0xf0] ss:$8 sps:$4 sm:$0xff]   ;;  %v3617_v1 = vld [vmem:[#allocation8 + $0x40] sm:$0xff]  }
  0x70   :  { %2674 = vmatpush3.bf16.msra.mxu0 %v3983_v12  ;;  %3150 = vmatpush3.bf16.msra.mxu1 %v3604_v25  ;;  %v3620_v25 = vld [vmem:[#allocation8 + $0x58] sm:$0xff]  }
  0x71   :  { %2675 = vmatprep.subr.bf16.mxu0 %v3986_v13  ;;  %3151 = vmatprep.subr.bf16.mxu1 %v3605_v27 }
  0x74   :  { %2676 = vmatpush3.bf16.msra.mxu0 %v3989_v14  ;;  %3152 = vmatpush3.bf16.msra.mxu1 %v3605_v27 }
  0x75   :  { %2677 = vmatprep.subr.bf16.mxu0 %v3992_v15  ;;  %3153 = vmatprep.subr.bf16.mxu1 %v3606_v29 }
  0x78   :  { %2678 = vmatpush3.bf16.msra.mxu0 %v3995_v16  ;;  %3154 = vmatpush3.bf16.msra.mxu1 %v3606_v29 }
  0x79   :  { %3155 = vmatprep.subr.bf16.mxu1 %v3607_v31 }
  0x7b   :  { %452 = vmatmul.mubr.bf16.vlgmr.msra.gmra.mrb[0].mxu0 %v3555_v17 }
  0x7c   :  { %459 = vmatprep.mubr.bf16.mxu0 %v3556_v18  ;;  %3156 = vmatpush3.bf16.msra.mxu1 %v3607_v31 }
  0x7d   :  { %3157 = vmatprep.subr.bf16.mxu1 %v3608_v33 }
  0x80   :  { %3158 = vmatpush3.bf16.msra.mxu1 %v3608_v33 }
  0x81   :  { %3191 = vmatprep.subr.bf16.mxu1 %v3609_v35 }
  0x83   :  { %460 = vmatmul.mubr.bf16.gmra.mrb[4].mxu0 %v3558_v19  ;;  %3160 = vmatmul.mubr.bf16.vlgmr.msra.gmra.mrb[0].mxu1 %v3956_v3 }
  0x84   :  { %467 = vmatprep.mubr.bf16.mxu0 %v3559_v20  ;;  %3163 = vmatprep.mubr.bf16.mxu1 %v3962_v5  ;;  %v3619_v20 = vld [vmem:[#allocation8 + $0x50] sm:$0xff]  }
  0x85   :  { %3192 = vmatpush3.bf16.msra.mxu1 %v3609_v35  ;;  %v3621_v35 = vld [vmem:[#allocation8 + $0x60] sm:$0xff]  }
  0x86   :  { %3193 = vmatprep.subr.bf16.mxu1 %v3610_v37 }
  0x89   :  { %3194 = vmatpush3.bf16.msra.mxu1 %v3610_v37 }
  0x8a   :  { %3195 = vmatprep.subr.bf16.mxu1 %v3611_v39 }
  0x8b   :  { %468 = vmatmul.mubr.bf16.gmra.mrb[8].mxu0 %v3999_v24  ;;  %3164 = vmatmul.mubr.bf16.gmra.mrb[4].mxu1 %v3968_v7 }
  0x8c   :  { %475 = vmatprep.mubr.bf16.mxu0 %v4001_v26  ;;  %3167 = vmatprep.mubr.bf16.mxu1 %v3973_v9 }
  0x8d   :  { %3196 = vmatpush3.bf16.msra.mxu1 %v3611_v39 }
  0x8e   :  { %3197 = vmatprep.subr.bf16.mxu1 %v3612_v41 }
  0x91   :  { %3198 = vmatpush3.bf16.msra.mxu1 %v3612_v41 }
  0x92   :  { %3199 = vmatprep.subr.bf16.mxu1 %v3613_v51 }
  0x93   :  { %476 = vmatmul.mubr.bf16.gmra.mrb[12].mxu0 %v4005_v28  ;;  %3168 = vmatmul.mubr.bf16.gmra.mrb[8].mxu1 %v3983_v12 }
  0x94   :  { %483 = vmatprep.mubr.bf16.mxu0 %v4007_v30  ;;  %3171 = vmatprep.mubr.bf16.mxu1 %v3989_v14 }
  0x95   :  { %3200 = vmatpush3.bf16.msra.mxu1 %v3613_v51  ;;  %v3622_v51 = vld [vmem:[#allocation8 + $0x68] sm:$0xff]  }
  0x96   :  { %3201 = vmatprep.subr.bf16.mxu1 %v3614_v54 }
  0x99   :  { %3202 = vmatpush3.bf16.msra.mxu1 %v3614_v54 }
  0x9a   :  { %3203 = vmatprep.subr.bf16.mxu1 %v3615_v55 }
  0x9b   :  { %484 = vmatmul.mubr.bf16.gmra.mrb[16].mxu0 %v4011_v32  ;;  %3172 = vmatmul.mubr.bf16.gmra.mrb[12].mxu1 %v3995_v16  ;;  %v3618_v16 = vld [vmem:[#allocation8 + $0x48] sm:$0xff]  }
  0x9c   :  { %491 = vmatprep.mubr.bf16.mxu0 %v4013_v34  ;;  %3175 = vmatprep.mubr.bf16.mxu1 %v3951_v0 }
  0x9d   :  { %3204 = vmatpush3.bf16.msra.mxu1 %v3615_v55 }
  0x9e   :  { %3205 = vmatprep.subr.bf16.mxu1 %v3616_v58 }
  0xa1   :  { %3206 = vmatpush3.bf16.msra.mxu1 %v3616_v58 }
  0xa2   :  { %3239 = vmatprep.subr.bf16.mxu1 %v3617_v1 }
  0xa3   :  { %492 = vmatmul.mubr.bf16.gmra.mrb[20].mxu0 %v4017_v36  ;;  %3176 = vmatmul.mubr.bf16.gmra.mrb[16].mxu1 %v3954_v2 }
  0xa4   :  { %499 = vmatprep.mubr.bf16.mxu0 %v4019_v38  ;;  %3179 = vmatprep.mubr.bf16.mxu1 %v3959_v4 }
  0xab   :  { %500 = vmatmul.mubr.bf16.gmra.mrb[24].mxu0 %v4025_v40  ;;  %3180 = vmatmul.mubr.bf16.gmra.mrb[20].mxu1 %v3965_v6 }
  0xac   :  { %507 = vmatprep.mubr.bf16.mxu0 %v4027_v42  ;;  %3183 = vmatprep.mubr.bf16.mxu1 %v3971_v8 }
  0xb3   :  { %508 = vmatmul.mubr.bf16.gmra.mrb[28].mxu0 %v4033_v43  ;;  %3184 = vmatmul.mubr.bf16.gmra.mrb[24].mxu1 %v3976_v10 }
  0xb4   :  { %515 = vmatprep.mubr.bf16.mxu0 %v4035_v44  ;;  %3187 = vmatprep.mubr.bf16.mxu1 %v3986_v13 }
  0xbb   :  { %516 = vmatmul.mubr.bf16.gmra.mrb[32].mxu0 %v4041_v45  ;;  %3188 = vmatmul.mubr.bf16.gmra.mrb[28].mxu1 %v3992_v15 }
  0xbc   :  { %523 = vmatprep.mubr.bf16.mxu0 %v4043_v46 }
  0xc3   :  { %524 = vmatmul.mubr.bf16.gmra.mrb[36].mxu0 %v4049_v47 }
  0xc4   :  { %531 = vmatprep.mubr.bf16.mxu0 %v4051_v48 }
  0xcb   :  { %532 = vmatmul.mubr.bf16.gmra.mrb[40].mxu0 %v4057_v49 }
  0xcc   :  { %539 = vmatprep.mubr.bf16.mxu0 %v4059_v50 }
  0xd3   :  { %540 = vmatmul.mubr.bf16.gmra.mrb[44].mxu0 %v4065_v52 }
  0xd4   :  { %547 = vmatprep.mubr.bf16.mxu0 %v4067_v53 }
  0xdb   :  { %548 = vmatmul.mubr.bf16.gmra.mrb[48].mxu0 %v4073_v56 }
  0xdc   :  { %555 = vmatprep.mubr.bf16.mxu0 %v4075_v57 }
  0xe3   :  { %556 = vmatmul.mubr.bf16.gmra.mrb[52].mxu0 %v4080_v59 }
  0xe4   :  { %563 = vmatprep.mubr.bf16.mxu0 %v4082_v60 }
  0xeb   :  { %564 = vmatmul.mubr.bf16.gmra.mrb[56].mxu0 %v4086_v61 }
  0xec   :  { %571 = vmatprep.mubr.bf16.mxu0 %v4088_v62 }
  0xf3   :  { %572 = vmatmul.mubr.bf16.gmra.mrb[60].mxu0 %v4092_v63 }
  0xf4   :  { %1165 = vmatprep.mubr.bf16.mxu0 %v3979_v11 }
 0x14e   :  { %v2679_v0 = vpop.f32.mrb[0].mxu0 }
 0x14f   :  { %v2680_v2 = vpop.f32.mrb[1].mxu0 }
 0x150   :  { %v2681_v3 = vadd.f32 %v2680_v2, %v2679_v0  ;;  %v2682_v4 = vpop.f32.mrb[2].mxu0 }
 0x151   :  { %v2683_v5 = vpop.f32.mrb[3].mxu0 }
 0x152   :  { %v2684_v6 = vadd.f32 %v2683_v5, %v2682_v4 }
 0x154   :  { %v580_v7 = vpack.c.bf16 %v2684_v6, %v2681_v3 }
 0x156   :  { %v2685_v8 = vpop.f32.mrb[4].mxu0  ;;  %3207 = vmatprep.mubr.bf16.mxu1 %v580_v7 }
 0x157   :  { %v2686_v9 = vpop.f32.mrb[5].mxu0 }
 0x158   :  { %v2687_v10 = vadd.f32 %v2686_v9, %v2685_v8  ;;  %v2688_v12 = vpop.f32.mrb[6].mxu0 }
 0x159   :  { %v2689_v13 = vpop.f32.mrb[7].mxu0 }
 0x15a   :  { %v2690_v14 = vadd.f32 %v2689_v13, %v2688_v12 }
 0x15c   :  { %v581_v15 = vpack.c.bf16 %v2690_v14, %v2687_v10 }
 0x15e   :  { %v2691_v17 = vpop.f32.mrb[8].mxu0  ;;  %3208 = vmatmul.mubr.bf16.vlgmr.msra.gmra.mrb[0].mxu1 %v581_v15 }
 0x15f   :  { %v2692_v11 = vpop.f32.mrb[9].mxu0  ;;  %3240 = vmatpush3.bf16.msra.mxu1 %v3617_v1 }
 0x160   :  { %v2693_v18 = vadd.f32 %v2692_v11, %v2691_v17  ;;  %v2694_v19 = vpop.f32.mrb[10].mxu0  ;;  %3241 = vmatprep.subr.bf16.mxu1 %v3618_v16 }
 0x161   :  { %v2695_v21 = vpop.f32.mrb[11].mxu0 }
 0x162   :  { %v2696_v22 = vadd.f32 %v2695_v21, %v2694_v19 }
 0x163   :  { %3242 = vmatpush3.bf16.msra.mxu1 %v3618_v16 }
 0x164   :  { %v582_v23 = vpack.c.bf16 %v2696_v22, %v2693_v18  ;;  %3243 = vmatprep.subr.bf16.mxu1 %v3619_v20 }
 0x166   :  { %v2697_v27 = vpop.f32.mrb[12].mxu0  ;;  %3211 = vmatprep.mubr.bf16.mxu1 %v582_v23 }
 0x167   :  { %v2698_v29 = vpop.f32.mrb[13].mxu0  ;;  %3244 = vmatpush3.bf16.msra.mxu1 %v3619_v20 }
 0x168   :  { %v2699_v31 = vadd.f32 %v2698_v29, %v2697_v27  ;;  %v2700_v33 = vpop.f32.mrb[14].mxu0  ;;  %3245 = vmatprep.subr.bf16.mxu1 %v3620_v25 }
 0x169   :  { %v2701_v37 = vpop.f32.mrb[15].mxu0 }
 0x16a   :  { %v2702_v39 = vadd.f32 %v2701_v37, %v2700_v33 }
 0x16b   :  { %3246 = vmatpush3.bf16.msra.mxu1 %v3620_v25 }
 0x16c   :  { %v583_v41 = vpack.c.bf16 %v2702_v39, %v2699_v31  ;;  %3247 = vmatprep.subr.bf16.mxu1 %v3621_v35 }
 0x16e   :  { %v2703_v54 = vpop.f32.mrb[16].mxu0  ;;  %3212 = vmatmul.mubr.bf16.gmra.mrb[4].mxu1 %v583_v41 }
 0x16f   :  { %v2704_v55 = vpop.f32.mrb[17].mxu0  ;;  %3248 = vmatpush3.bf16.msra.mxu1 %v3621_v35 }
 0x170   :  { %v2705_v58 = vadd.f32 %v2704_v55, %v2703_v54  ;;  %v2706_v0 = vpop.f32.mrb[18].mxu0  ;;  %3249 = vmatprep.subr.bf16.mxu1 %v3622_v51 }
 0x171   :  { %v2707_v1 = vpop.f32.mrb[19].mxu0 }
 0x172   :  { %v2708_v2 = vadd.f32 %v2707_v1, %v2706_v0 }
 0x173   :  { %3250 = vmatpush3.bf16.msra.mxu1 %v3622_v51 }
 0x174   :  { %v584_v3 = vpack.c.bf16 %v2708_v2, %v2705_v58 }
 0x176   :  { %v2709_v4 = vpop.f32.mrb[20].mxu0  ;;  %3215 = vmatprep.mubr.bf16.mxu1 %v584_v3 }
 0x177   :  { %v2710_v5 = vpop.f32.mrb[21].mxu0 }
 0x178   :  { %v2711_v6 = vadd.f32 %v2710_v5, %v2709_v4  ;;  %v2712_v7 = vpop.f32.mrb[22].mxu0 }
 0x179   :  { %v2713_v8 = vpop.f32.mrb[23].mxu0 }
 0x17a   :  { %v2714_v9 = vadd.f32 %v2713_v8, %v2712_v7 }
 0x17c   :  { %v585_v10 = vpack.c.bf16 %v2714_v9, %v2711_v6 }
 0x17e   :  { %v2715_v12 = vpop.f32.mrb[24].mxu0  ;;  %3216 = vmatmul.mubr.bf16.gmra.mrb[8].mxu1 %v585_v10 }
 0x17f   :  { %v2716_v13 = vpop.f32.mrb[25].mxu0 }
 0x180   :  { %v2717_v14 = vadd.f32 %v2716_v13, %v2715_v12  ;;  %v2718_v15 = vpop.f32.mrb[26].mxu0 }
 0x181   :  { %v2719_v16 = vpop.f32.mrb[27].mxu0 }
 0x182   :  { %v2720_v17 = vadd.f32 %v2719_v16, %v2718_v15 }
 0x184   :  { %v586_v11 = vpack.c.bf16 %v2720_v17, %v2717_v14 }
 0x186   :  { %v2721_v18 = vpop.f32.mrb[28].mxu0  ;;  %3219 = vmatprep.mubr.bf16.mxu1 %v586_v11 }
 0x187   :  { %v2722_v19 = vpop.f32.mrb[29].mxu0 }
 0x188   :  { %v2723_v20 = vadd.f32 %v2722_v19, %v2721_v18  ;;  %v2724_v21 = vpop.f32.mrb[30].mxu0 }
 0x189   :  { %v2725_v22 = vpop.f32.mrb[31].mxu0 }
 0x18a   :  { %v2726_v23 = vadd.f32 %v2725_v22, %v2724_v21  ;;  %v3623_v22 = vld [vmem:[#allocation8 + $0x70] sm:$0xff]  }
 0x18b   :  { %3251 = vmatprep.subr.bf16.mxu1 %v3623_v22 }
 0x18c   :  { %v587_v25 = vpack.c.bf16 %v2726_v23, %v2723_v20  ;;  %3252 = vmatpush3.bf16.msra.mxu1 %v3623_v22 }
 0x18e   :  { %v2727_v27 = vpop.f32.mrb[32].mxu0  ;;  %3220 = vmatmul.mubr.bf16.gmra.mrb[12].mxu1 %v587_v25 }
 0x18f   :  { %v2728_v29 = vpop.f32.mrb[33].mxu0 }
 0x190   :  { %v2729_v31 = vadd.f32 %v2728_v29, %v2727_v27  ;;  %v2730_v33 = vpop.f32.mrb[34].mxu0  ;;  %v3624_v27 = vld [vmem:[#allocation8 + $0x78] sm:$0xff]  }
 0x191   :  { %v2731_v35 = vpop.f32.mrb[35].mxu0  ;;  %3253 = vmatprep.subr.bf16.mxu1 %v3624_v27 }
 0x192   :  { %v2732_v37 = vadd.f32 %v2731_v35, %v2730_v33  ;;  %3254 = vmatpush3.bf16.msra.mxu1 %v3624_v27 }
 0x194   :  { %v588_v39 = vpack.c.bf16 %v2732_v37, %v2729_v31 }
 0x196   :  { %v2733_v41 = vpop.f32.mrb[36].mxu0  ;;  %3223 = vmatprep.mubr.bf16.mxu1 %v588_v39 }
 0x197   :  { %v2734_v51 = vpop.f32.mrb[37].mxu0 }
 0x198   :  { %v2735_v54 = vadd.f32 %v2734_v51, %v2733_v41  ;;  %v2736_v55 = vpop.f32.mrb[38].mxu0 }
 0x199   :  { %v2737_v58 = vpop.f32.mrb[39].mxu0 }
 0x19a   :  { %v2738_v0 = vadd.f32 %v2737_v58, %v2736_v55 }
 0x19c   :  { %v589_v1 = vpack.c.bf16 %v2738_v0, %v2735_v54 }
 0x19e   :  { %v2739_v2 = vpop.f32.mrb[40].mxu0  ;;  %3224 = vmatmul.mubr.bf16.gmra.mrb[16].mxu1 %v589_v1 }
 0x19f   :  { %v2740_v3 = vpop.f32.mrb[41].mxu0 }
 0x1a0   :  { %v2741_v4 = vadd.f32 %v2740_v3, %v2739_v2  ;;  %v2742_v5 = vpop.f32.mrb[42].mxu0 }
 0x1a1   :  { %v2743_v6 = vpop.f32.mrb[43].mxu0 }
 0x1a2   :  { %v2744_v7 = vadd.f32 %v2743_v6, %v2742_v5 }
 0x1a4   :  { %v590_v8 = vpack.c.bf16 %v2744_v7, %v2741_v4 }
 0x1a6   :  { %v2745_v9 = vpop.f32.mrb[44].mxu0  ;;  %3227 = vmatprep.mubr.bf16.mxu1 %v590_v8 }
 0x1a7   :  { %v2746_v10 = vpop.f32.mrb[45].mxu0 }
 0x1a8   :  { %v2747_v12 = vadd.f32 %v2746_v10, %v2745_v9  ;;  %v2748_v13 = vpop.f32.mrb[46].mxu0  ;;  %v4099_v9 = vld [vmem:[%s4332_s3] ss:$0 sm:$0xff] }
 0x1a9   :  { %v2749_v14 = vpop.f32.mrb[47].mxu0 }
 0x1aa   :  { %v2750_v15 = vadd.f32 %v2749_v14, %v2748_v13 }
 0x1ac   :  { %v591_v16 = vpack.c.bf16 %v2750_v15, %v2747_v12 }
 0x1ae   :  { %v2751_v17 = vpop.f32.mrb[48].mxu0  ;;  %3228 = vmatmul.mubr.bf16.gmra.mrb[20].mxu1 %v591_v16 }
 0x1af   :  { %v2752_v11 = vpop.f32.mrb[49].mxu0 }
 0x1b0   :  { %v2753_v18 = vadd.f32 %v2752_v11, %v2751_v17  ;;  %v2754_v19 = vpop.f32.mrb[50].mxu0 }
 0x1b1   :  { %v2755_v20 = vpop.f32.mrb[51].mxu0 }
 0x1b2   :  { %v2756_v21 = vadd.f32 %v2755_v20, %v2754_v19 }
 0x1b4   :  { %v592_v23 = vpack.c.bf16 %v2756_v21, %v2753_v18 }
 0x1b6   :  { %v2757_v25 = vpop.f32.mrb[52].mxu0  ;;  %3231 = vmatprep.mubr.bf16.mxu1 %v592_v23 }
 0x1b7   :  { %v2758_v29 = vpop.f32.mrb[53].mxu0 }
 0x1b8   :  { %v2759_v31 = vadd.f32 %v2758_v29, %v2757_v25  ;;  %v2760_v33 = vpop.f32.mrb[54].mxu0 }
 0x1b9   :  { %v2761_v35 = vpop.f32.mrb[55].mxu0 }
 0x1ba   :  { %v2762_v37 = vadd.f32 %v2761_v35, %v2760_v33 }
 0x1bc   :  { %v593_v39 = vpack.c.bf16 %v2762_v37, %v2759_v31 }
 0x1be   :  { %v2763_v41 = vpop.f32.mrb[56].mxu0  ;;  %3232 = vmatmul.mubr.bf16.gmra.mrb[24].mxu1 %v593_v39 }
 0x1bf   :  { %v2764_v51 = vpop.f32.mrb[57].mxu0 }
 0x1c0   :  { %v2765_v54 = vadd.f32 %v2764_v51, %v2763_v41  ;;  %v2766_v55 = vpop.f32.mrb[58].mxu0 }
 0x1c1   :  { %v2767_v58 = vpop.f32.mrb[59].mxu0 }
 0x1c2   :  { %v2768_v0 = vadd.f32 %v2767_v58, %v2766_v55 }
 0x1c4   :  { %v594_v1 = vpack.c.bf16 %v2768_v0, %v2765_v54 }
 0x1c6   :  { %v2769_v2 = vpop.f32.mrb[60].mxu0  ;;  %3235 = vmatprep.mubr.bf16.mxu1 %v594_v1 }
 0x1c7   :  { %v2770_v3 = vpop.f32.mrb[61].mxu0 }
 0x1c8   :  { %v2771_v4 = vadd.f32 %v2770_v3, %v2769_v2  ;;  %v2772_v5 = vpop.f32.mrb[62].mxu0 }
 0x1c9   :  { %v2773_v6 = vpop.f32.mrb[63].mxu0 }
 0x1ca   :  { %v2774_v7 = vadd.f32 %v2773_v6, %v2772_v5 }
 0x1cc   :  { %v595_v8 = vpack.c.bf16 %v2774_v7, %v2771_v4 }
 0x1ce   :  { %3236 = vmatmul.mubr.bf16.gmra.mrb[28].mxu1 %v595_v8 }
 0x231   :  { %v3209_v10 = vpop.f32.mrb[0].mxu1 }
 0x232   :  { %v1055_v12 = vadd.f32 %v3209_v10, %v4099_v9  ;;  %v919_v13 = vpop.f32.mrb[1].mxu1 }
 0x233   :  { %v1053_v14 = vadd.f32 %v4099_v9, %v919_v13  ;;  %v3210_v15 = vpop.f32.mrb[2].mxu1 }
 0x234   :  { %v1056_v16 = vadd.f32 %v3210_v15, %v4099_v9  ;;  %v922_v17 = vpop.f32.mrb[3].mxu1  ;;  %v1087_v18 = vmax.f32 %v1055_v12, 0.0 }
 0x235   :  { %v1054_v11 = vadd.f32 %v4099_v9, %v922_v17  ;;  %v1085_v20 = vmax.f32 %v1053_v14, 0.0 }
 0x236   :  { %v1088_v19 = vmax.f32 %v1056_v16, 0.0 }
 0x237   :  { %v1086_v21 = vmax.f32 %v1054_v11, 0.0 }
 0x238   :  { %v4105_v22 = vpack.c.bf16 %v1088_v19, %v1087_v18 }
 0x239   :  { %v4107_v23 = vpack.c.bf16 %v1086_v21, %v1085_v20 }
 0x23b   :  { %3255 = vmatprep.mubr.bf16.mxu1 %v4107_v23 }
 0x23c   :  { %3256 = vmatmul.mubr.bf16.vlgmr.msra.gmra.mrb[32].mxu1 %v4105_v22 }
 0x241   :  { %v3213_v25 = vpop.f32.mrb[4].mxu1 }
 0x242   :  { %v1059_v27 = vadd.f32 %v3213_v25, %v4099_v9  ;;  %v935_v29 = vpop.f32.mrb[5].mxu1 }
 0x243   :  { %v1057_v31 = vadd.f32 %v4099_v9, %v935_v29  ;;  %v3214_v33 = vpop.f32.mrb[6].mxu1 }
 0x244   :  { %v1060_v35 = vadd.f32 %v3214_v33, %v4099_v9  ;;  %v938_v37 = vpop.f32.mrb[7].mxu1  ;;  %v1091_v41 = vmax.f32 %v1059_v27, 0.0 }
 0x245   :  { %v1058_v39 = vadd.f32 %v4099_v9, %v938_v37  ;;  %v1089_v54 = vmax.f32 %v1057_v31, 0.0 }
 0x246   :  { %v1092_v51 = vmax.f32 %v1060_v35, 0.0 }
 0x247   :  { %v1090_v55 = vmax.f32 %v1058_v39, 0.0 }
 0x248   :  { %v4115_v58 = vpack.c.bf16 %v1092_v51, %v1091_v41 }
 0x249   :  { %v4117_v0 = vpack.c.bf16 %v1090_v55, %v1089_v54 }
 0x24b   :  { %3259 = vmatprep.mubr.bf16.mxu1 %v4117_v0 }
 0x24c   :  { %3260 = vmatmul.mubr.bf16.gmra.mrb[36].mxu1 %v4115_v58 }
 0x251   :  { %v3217_v1 = vpop.f32.mrb[8].mxu1 }
 0x252   :  { %v1063_v2 = vadd.f32 %v3217_v1, %v4099_v9  ;;  %v951_v3 = vpop.f32.mrb[9].mxu1 }
 0x253   :  { %v1061_v4 = vadd.f32 %v4099_v9, %v951_v3  ;;  %v3218_v5 = vpop.f32.mrb[10].mxu1 }
 0x254   :  { %v1064_v6 = vadd.f32 %v3218_v5, %v4099_v9  ;;  %v954_v7 = vpop.f32.mrb[11].mxu1  ;;  %v1095_v10 = vmax.f32 %v1063_v2, 0.0 }
 0x255   :  { %v1062_v8 = vadd.f32 %v4099_v9, %v954_v7  ;;  %v1093_v13 = vmax.f32 %v1061_v4, 0.0 }
 0x256   :  { %v1096_v12 = vmax.f32 %v1064_v6, 0.0 }
 0x257   :  { %v1094_v14 = vmax.f32 %v1062_v8, 0.0 }
 0x258   :  { %v4125_v15 = vpack.c.bf16 %v1096_v12, %v1095_v10 }
 0x259   :  { %v4127_v16 = vpack.c.bf16 %v1094_v14, %v1093_v13 }
 0x25b   :  { %3263 = vmatprep.mubr.bf16.mxu1 %v4127_v16 }
 0x25c   :  { %3264 = vmatmul.mubr.bf16.gmra.mrb[40].mxu1 %v4125_v15 }
 0x261   :  { %v3221_v17 = vpop.f32.mrb[12].mxu1 }
 0x262   :  { %v1067_v11 = vadd.f32 %v3221_v17, %v4099_v9  ;;  %v967_v18 = vpop.f32.mrb[13].mxu1 }
 0x263   :  { %v1065_v19 = vadd.f32 %v4099_v9, %v967_v18  ;;  %v3222_v20 = vpop.f32.mrb[14].mxu1 }
 0x264   :  { %v1068_v21 = vadd.f32 %v3222_v20, %v4099_v9  ;;  %v970_v25 = vpop.f32.mrb[15].mxu1  ;;  %v1099_v29 = vmax.f32 %v1067_v11, 0.0 }
 0x265   :  { %v1066_v27 = vadd.f32 %v4099_v9, %v970_v25  ;;  %v1097_v33 = vmax.f32 %v1065_v19, 0.0 }
 0x266   :  { %v1100_v31 = vmax.f32 %v1068_v21, 0.0 }
 0x267   :  { %v1098_v35 = vmax.f32 %v1066_v27, 0.0 }
 0x268   :  { %v4135_v37 = vpack.c.bf16 %v1100_v31, %v1099_v29 }
 0x269   :  { %v4137_v39 = vpack.c.bf16 %v1098_v35, %v1097_v33 }
 0x26b   :  { %3267 = vmatprep.mubr.bf16.mxu1 %v4137_v39 }
 0x26c   :  { %3268 = vmatmul.mubr.bf16.gmra.mrb[44].mxu1 %v4135_v37 }
 0x271   :  { %v3225_v41 = vpop.f32.mrb[16].mxu1 }
 0x272   :  { %v1071_v51 = vadd.f32 %v3225_v41, %v4099_v9  ;;  %v983_v54 = vpop.f32.mrb[17].mxu1 }
 0x273   :  { %v1069_v55 = vadd.f32 %v4099_v9, %v983_v54  ;;  %v3226_v1 = vpop.f32.mrb[18].mxu1 }
 0x274   :  { %v1072_v2 = vadd.f32 %v3226_v1, %v4099_v9  ;;  %v986_v3 = vpop.f32.mrb[19].mxu1  ;;  %v1103_v5 = vmax.f32 %v1071_v51, 0.0 }
 0x275   :  { %v1070_v4 = vadd.f32 %v4099_v9, %v986_v3  ;;  %v1101_v7 = vmax.f32 %v1069_v55, 0.0 }
 0x276   :  { %v1104_v6 = vmax.f32 %v1072_v2, 0.0 }
 0x277   :  { %v1102_v8 = vmax.f32 %v1070_v4, 0.0 }
 0x278   :  { %v1126_v10 = vpack.c.bf16 %v1104_v6, %v1103_v5 }
 0x279   :  { %v1125_v12 = vpack.c.bf16 %v1102_v8, %v1101_v7 }
 0x27b   :  { %2823 = vmatprep.subr.bf16.mxu0 %v1125_v12  ;;  %3271 = vmatprep.mubr.bf16.mxu1 %v1125_v12 }
 0x27c   :  { %2824 = vmatpush3.bf16.msra.mxu0 %v4107_v23  ;;  %3272 = vmatmul.mubr.bf16.gmra.mrb[48].mxu1 %v1126_v10 }
 0x27d   :  { %2825 = vmatprep.subr.bf16.mxu0 %v1126_v10 }
 0x280   :  { %2826 = vmatpush3.bf16.msra.mxu0 %v4105_v22 }
 0x281   :  { %v3229_v13 = vpop.f32.mrb[20].mxu1 }
 0x282   :  { %v1075_v14 = vadd.f32 %v3229_v13, %v4099_v9  ;;  %v999_v17 = vpop.f32.mrb[21].mxu1 }
 0x283   :  { %v1073_v11 = vadd.f32 %v4099_v9, %v999_v17  ;;  %v3230_v18 = vpop.f32.mrb[22].mxu1 }
 0x284   :  { %v1076_v19 = vadd.f32 %v3230_v18, %v4099_v9  ;;  %v1002_v20 = vpop.f32.mrb[23].mxu1  ;;  %v1107_v25 = vmax.f32 %v1075_v14, 0.0 }
 0x285   :  { %v1074_v21 = vadd.f32 %v4099_v9, %v1002_v20  ;;  %v1105_v29 = vmax.f32 %v1073_v11, 0.0 }
 0x286   :  { %v1108_v27 = vmax.f32 %v1076_v19, 0.0 }
 0x287   :  { %v1106_v23 = vmax.f32 %v1074_v21, 0.0 }
 0x288   :  { %v1128_v31 = vpack.c.bf16 %v1108_v27, %v1107_v25  ;;  %v3626_v27 = vld [vmem:[#allocation8 + $0x8] sm:$0xff]  }
 0x289   :  { %v1127_v33 = vpack.c.bf16 %v1106_v23, %v1105_v29  ;;  %v3627_v29 = vld [vmem:[#allocation8 + $0x10] sm:$0xff]   ;;  %v3628_v23 = vld [vmem:[#allocation8 + $0x18] sm:$0xff]  }
 0x28b   :  { %2827 = vmatprep.subr.bf16.mxu0 %v1127_v33  ;;  %3275 = vmatprep.mubr.bf16.mxu1 %v1127_v33  ;;  %v4174_v33 = vld [vmem:[#allocation2 + $0x24] ss:$8 sps:$4 sm:$0xff]  }
 0x28c   :  { %2828 = vmatpush3.bf16.msra.mxu0 %v4117_v0  ;;  %3276 = vmatmul.mubr.bf16.gmra.mrb[52].mxu1 %v1128_v31 }
 0x28d   :  { %2829 = vmatprep.subr.bf16.mxu0 %v1128_v31  ;;  %v4168_v31 = vld [vmem:[#allocation2 + $0x14] ss:$8 sps:$4 sm:$0xff]  }
 0x290   :  { %2830 = vmatpush3.bf16.msra.mxu0 %v4115_v58 }
 0x291   :  { %v3233_v22 = vpop.f32.mrb[24].mxu1 }
 0x292   :  { %v1079_v35 = vadd.f32 %v3233_v22, %v4099_v9  ;;  %v1015_v41 = vpop.f32.mrb[25].mxu1 }
 0x293   :  { %v1077_v51 = vadd.f32 %v4099_v9, %v1015_v41  ;;  %v3234_v54 = vpop.f32.mrb[26].mxu1 }
 0x294   :  { %v1080_v55 = vadd.f32 %v3234_v54, %v4099_v9  ;;  %v1018_v1 = vpop.f32.mrb[27].mxu1  ;;  %v1111_v3 = vmax.f32 %v1079_v35, 0.0  ;;  %v3636_v35 = vld [vmem:[#allocation10 + $0x58] sm:$0xff]  }
 0x295   :  { %v1078_v2 = vadd.f32 %v4099_v9, %v1018_v1  ;;  %v1109_v5 = vmax.f32 %v1077_v51, 0.0  ;;  %v3637_v1 = vld [vmem:[#allocation10 + $0x60] sm:$0xff]  }
 0x296   :  { %v1112_v4 = vmax.f32 %v1080_v55, 0.0 }
 0x297   :  { %v1110_v0 = vmax.f32 %v1078_v2, 0.0 }
 0x298   :  { %v1130_v6 = vpack.c.bf16 %v1112_v4, %v1111_v3 }
 0x299   :  { %v1129_v7 = vpack.c.bf16 %v1110_v0, %v1109_v5  ;;  %v3638_v5 = vld [vmem:[#allocation10 + $0x68] sm:$0xff]  }
 0x29b   :  { %2831 = vmatprep.subr.bf16.mxu0 %v1129_v7  ;;  %3279 = vmatprep.mubr.bf16.mxu1 %v1129_v7 }
 0x29c   :  { %2832 = vmatpush3.bf16.msra.mxu0 %v4127_v16  ;;  %3280 = vmatmul.mubr.bf16.gmra.mrb[56].mxu1 %v1130_v6 }
 0x29d   :  { %2833 = vmatprep.subr.bf16.mxu0 %v1130_v6 }
 0x2a0   :  { %2834 = vmatpush3.bf16.msra.mxu0 %v4125_v15  ;;  %v3625_v15 = vld [vmem:[#allocation8] sm:$0xff]  }
 0x2a1   :  { %v3237_v58 = vpop.f32.mrb[28].mxu1  ;;  %3287 = vmatprep.subr.bf16.mxu1 %v3625_v15 }
 0x2a2   :  { %v1083_v8 = vadd.f32 %v3237_v58, %v4099_v9  ;;  %v1031_v10 = vpop.f32.mrb[29].mxu1  ;;  %3288 = vmatpush3.bf16.msra.mxu1 %v3625_v15 }
 0x2a3   :  { %v1081_v12 = vadd.f32 %v4099_v9, %v1031_v10  ;;  %v3238_v13 = vpop.f32.mrb[30].mxu1  ;;  %3289 = vmatprep.subr.bf16.mxu1 %v3626_v27 }
 0x2a4   :  { %v1084_v14 = vadd.f32 %v3238_v13, %v4099_v9  ;;  %v1034_v17 = vpop.f32.mrb[31].mxu1  ;;  %v1115_v18 = vmax.f32 %v1083_v8, 0.0 }
 0x2a5   :  { %v1082_v11 = vadd.f32 %v4099_v9, %v1034_v17  ;;  %v1113_v20 = vmax.f32 %v1081_v12, 0.0  ;;  %v4165_v9 = vld [vmem:[#allocation2] ss:$8 sps:$4 sm:$0xff]  }
 0x2a6   :  { %v1116_v19 = vmax.f32 %v1084_v14, 0.0  ;;  %3290 = vmatpush3.bf16.msra.mxu1 %v3626_v27 }
 0x2a7   :  { %v1114_v16 = vmax.f32 %v1082_v11, 0.0  ;;  %3291 = vmatprep.subr.bf16.mxu1 %v3627_v29 }
 0x2a8   :  { %v1132_v21 = vpack.c.bf16 %v1116_v19, %v1115_v18 }
 0x2a9   :  { %v1131_v25 = vpack.c.bf16 %v1114_v16, %v1113_v20 }
 0x2aa   :  { %3292 = vmatpush3.bf16.msra.mxu1 %v3627_v29 }
 0x2ab   :  { %2835 = vmatprep.subr.bf16.mxu0 %v1131_v25  ;;  %3283 = vmatprep.mubr.bf16.mxu1 %v1131_v25 }
 0x2ac   :  { %2836 = vmatpush3.bf16.msra.mxu0 %v4137_v39  ;;  %3284 = vmatmul.mubr.bf16.gmra.mrb[60].mxu1 %v1132_v21  ;;  %v4171_v39 = vld [vmem:[#allocation2 + $0x10] ss:$8 sps:$4 sm:$0xff]  }
 0x2ad   :  { %2837 = vmatprep.subr.bf16.mxu0 %v1132_v21  ;;  %3293 = vmatprep.subr.bf16.mxu1 %v3628_v23 }
 0x2ae   :  { %3294 = vmatpush3.bf16.msra.mxu1 %v3628_v23 }
 0x2b0   :  { %2838 = vmatpush3.bf16.msra.mxu0 %v4135_v37 }
 0x2b3   :  { %1166 = vmatmul.mubr.bf16.vlgmr.msra.gmra.mrb[64].mxu0 %v4165_v9 }
 0x2b4   :  { %1173 = vmatprep.mubr.bf16.mxu0 %v4168_v31 }
 0x2bb   :  { %1174 = vmatmul.mubr.bf16.gmra.mrb[68].mxu0 %v4171_v39 }
 0x2bc   :  { %1181 = vmatprep.mubr.bf16.mxu0 %v4174_v33 }
 0x2c3   :  { %1182 = vmatmul.mubr.bf16.gmra.mrb[72].mxu0 %v3999_v24  ;;  %v3629_v24 = vld [vmem:[#allocation8 + $0x20] sm:$0xff]  }
 0x2c4   :  { %1189 = vmatprep.mubr.bf16.mxu0 %v4001_v26  ;;  %3295 = vmatprep.subr.bf16.mxu1 %v3629_v24  ;;  %v3630_v26 = vld [vmem:[#allocation8 + $0x28] sm:$0xff]  }
 0x2c5   :  { %3296 = vmatpush3.bf16.msra.mxu1 %v3629_v24 }
 0x2c6   :  { %3297 = vmatprep.subr.bf16.mxu1 %v3630_v26 }
 0x2c9   :  { %3298 = vmatpush3.bf16.msra.mxu1 %v3630_v26 }
 0x2cb   :  { %1190 = vmatmul.mubr.bf16.gmra.mrb[76].mxu0 %v4005_v28  ;;  %v3631_v28 = vld [vmem:[#allocation8 + $0x30] sm:$0xff]  }
 0x2cc   :  { %1197 = vmatprep.mubr.bf16.mxu0 %v4007_v30  ;;  %3299 = vmatprep.subr.bf16.mxu1 %v3631_v28  ;;  %v3632_v30 = vld [vmem:[#allocation8 + $0x38] sm:$0xff]  }
 0x2cd   :  { %3300 = vmatpush3.bf16.msra.mxu1 %v3631_v28 }
 0x2ce   :  { %3301 = vmatprep.subr.bf16.mxu1 %v3632_v30 }
 0x2d1   :  { %3302 = vmatpush3.bf16.msra.mxu1 %v3632_v30 }
 0x2d3   :  { %1198 = vmatmul.mubr.bf16.gmra.mrb[80].mxu0 %v4011_v32  ;;  %v3653_v32 = vld [vmem:[#allocation2 + $0x4] ss:$8 sps:$4 sm:$0xff]  }
 0x2d4   :  { %1205 = vmatprep.mubr.bf16.mxu0 %v4013_v34 }
 0x2db   :  { %1206 = vmatmul.mubr.bf16.gmra.mrb[84].mxu0 %v4017_v36  ;;  %v3633_v36 = vld [vmem:[#allocation10 + $0x40] sm:$0xff]  }
 0x2dc   :  { %1213 = vmatprep.mubr.bf16.mxu0 %v4019_v38  ;;  %3335 = vmatprep.subr.bf16.mxu1 %v3633_v36 }
 0x2e3   :  { %1214 = vmatmul.mubr.bf16.gmra.mrb[88].mxu0 %v4025_v40 }
 0x2e4   :  { %1221 = vmatprep.mubr.bf16.mxu0 %v4027_v42 }
 0x2eb   :  { %1222 = vmatmul.mubr.bf16.gmra.mrb[92].mxu0 %v4033_v43 }
 0x2ec   :  { %1229 = vmatprep.mubr.bf16.mxu0 %v4035_v44 }
 0x2f3   :  { %1230 = vmatmul.mubr.bf16.gmra.mrb[96].mxu0 %v4041_v45 }
 0x2f4   :  { %1237 = vmatprep.mubr.bf16.mxu0 %v4043_v46 }
 0x2fb   :  { %1238 = vmatmul.mubr.bf16.gmra.mrb[100].mxu0 %v4049_v47 }
 0x2fc   :  { %1245 = vmatprep.mubr.bf16.mxu0 %v4051_v48 }
 0x303   :  { %1246 = vmatmul.mubr.bf16.gmra.mrb[104].mxu0 %v4057_v49 }
 0x304   :  { %1253 = vmatprep.mubr.bf16.mxu0 %v4059_v50 }
 0x30b   :  { %1254 = vmatmul.mubr.bf16.gmra.mrb[108].mxu0 %v4065_v52 }
 0x30c   :  { %1261 = vmatprep.mubr.bf16.mxu0 %v4067_v53 }
 0x313   :  { %1262 = vmatmul.mubr.bf16.gmra.mrb[112].mxu0 %v4073_v56  ;;  %v3634_v56 = vld [vmem:[#allocation10 + $0x48] sm:$0xff]  }
 0x314   :  { %1269 = vmatprep.mubr.bf16.mxu0 %v4075_v57 }
 0x31b   :  { %1270 = vmatmul.mubr.bf16.gmra.mrb[116].mxu0 %v4080_v59 }
 0x31c   :  { %1277 = vmatprep.mubr.bf16.mxu0 %v4082_v60 }
 0x323   :  { %1278 = vmatmul.mubr.bf16.gmra.mrb[120].mxu0 %v4086_v61 }
 0x324   :  { %1285 = vmatprep.mubr.bf16.mxu0 %v4088_v62  ;;  %v3635_v62 = vld [vmem:[#allocation10 + $0x50] sm:$0xff]  }
 0x32b   :  { %1286 = vmatmul.mubr.bf16.gmra.mrb[124].mxu0 %v4092_v63 }
 0x32c   :  { %1879 = vmatprep.mubr.bf16.mxu0 %v3653_v32 }
 0x386   :  { %v2839_v34 = vpop.f32.mrb[64].mxu0 }
 0x387   :  { %v2840_v38 = vpop.f32.mrb[65].mxu0 }
 0x388   :  { %v2841_v40 = vadd.f32 %v2840_v38, %v2839_v34  ;;  %v2842_v42 = vpop.f32.mrb[66].mxu0 }
 0x389   :  { %v2843_v43 = vpop.f32.mrb[67].mxu0 }
 0x38a   :  { %v2844_v44 = vadd.f32 %v2843_v43, %v2842_v42 }
 0x38c   :  { %v1294_v45 = vpack.c.bf16 %v2844_v44, %v2841_v40 }
 0x38e   :  { %v2845_v46 = vpop.f32.mrb[68].mxu0  ;;  %3303 = vmatprep.mubr.bf16.mxu1 %v1294_v45 }
 0x38f   :  { %v2846_v47 = vpop.f32.mrb[69].mxu0 }
 0x390   :  { %v2847_v48 = vadd.f32 %v2846_v47, %v2845_v46  ;;  %v2848_v49 = vpop.f32.mrb[70].mxu0 }
 0x391   :  { %v2849_v50 = vpop.f32.mrb[71].mxu0 }
 0x392   :  { %v2850_v52 = vadd.f32 %v2849_v50, %v2848_v49 }
 0x394   :  { %v1295_v53 = vpack.c.bf16 %v2850_v52, %v2847_v48 }
 0x396   :  { %v2851_v57 = vpop.f32.mrb[72].mxu0  ;;  %3304 = vmatmul.mubr.bf16.vlgmr.msra.gmra.mrb[32].mxu1 %v1295_v53 }
 0x397   :  { %v2852_v59 = vpop.f32.mrb[73].mxu0  ;;  %3336 = vmatpush3.bf16.msra.mxu1 %v3633_v36 }
 0x398   :  { %v2853_v60 = vadd.f32 %v2852_v59, %v2851_v57  ;;  %v2854_v61 = vpop.f32.mrb[74].mxu0  ;;  %3337 = vmatprep.subr.bf16.mxu1 %v3634_v56 }
 0x399   :  { %v2855_v63 = vpop.f32.mrb[75].mxu0 }
 0x39a   :  { %v2856_v37 = vadd.f32 %v2855_v63, %v2854_v61 }
 0x39b   :  { %3338 = vmatpush3.bf16.msra.mxu1 %v3634_v56 }
 0x39c   :  { %v1296_v22 = vpack.c.bf16 %v2856_v37, %v2853_v60  ;;  %3339 = vmatprep.subr.bf16.mxu1 %v3635_v62 }
 0x39e   :  { %v2857_v41 = vpop.f32.mrb[76].mxu0  ;;  %3307 = vmatprep.mubr.bf16.mxu1 %v1296_v22 }
 0x39f   :  { %v2858_v51 = vpop.f32.mrb[77].mxu0  ;;  %3340 = vmatpush3.bf16.msra.mxu1 %v3635_v62 }
 0x3a0   :  { %v2859_v54 = vadd.f32 %v2858_v51, %v2857_v41  ;;  %v2860_v55 = vpop.f32.mrb[78].mxu0  ;;  %3341 = vmatprep.subr.bf16.mxu1 %v3636_v35 }
 0x3a1   :  { %v2861_v2 = vpop.f32.mrb[79].mxu0 }
 0x3a2   :  { %v2862_v3 = vadd.f32 %v2861_v2, %v2860_v55 }
 0x3a3   :  { %3342 = vmatpush3.bf16.msra.mxu1 %v3636_v35 }
 0x3a4   :  { %v1297_v4 = vpack.c.bf16 %v2862_v3, %v2859_v54  ;;  %3343 = vmatprep.subr.bf16.mxu1 %v3637_v1 }
 0x3a6   :  { %v2863_v0 = vpop.f32.mrb[80].mxu0  ;;  %3308 = vmatmul.mubr.bf16.gmra.mrb[36].mxu1 %v1297_v4 }
 0x3a7   :  { %v2864_v6 = vpop.f32.mrb[81].mxu0  ;;  %3344 = vmatpush3.bf16.msra.mxu1 %v3637_v1 }
 0x3a8   :  { %v2865_v7 = vadd.f32 %v2864_v6, %v2863_v0  ;;  %v2866_v58 = vpop.f32.mrb[82].mxu0  ;;  %3345 = vmatprep.subr.bf16.mxu1 %v3638_v5 }
 0x3a9   :  { %v2867_v8 = vpop.f32.mrb[83].mxu0 }
 0x3aa   :  { %v2868_v10 = vadd.f32 %v2867_v8, %v2866_v58 }
 0x3ab   :  { %3346 = vmatpush3.bf16.msra.mxu1 %v3638_v5 }
 0x3ac   :  { %v1298_v12 = vpack.c.bf16 %v2868_v10, %v2865_v7  ;;  %v3639_v7 = vld [vmem:[#allocation10 + $0x70] sm:$0xff]   ;;  %v3640_v10 = vld [vmem:[#allocation10 + $0x78] sm:$0xff]  }
 0x3ad   :  { %3347 = vmatprep.subr.bf16.mxu1 %v3639_v7 }
 0x3ae   :  { %v2869_v13 = vpop.f32.mrb[84].mxu0  ;;  %3311 = vmatprep.mubr.bf16.mxu1 %v1298_v12 }
 0x3af   :  { %v2870_v14 = vpop.f32.mrb[85].mxu0  ;;  %3348 = vmatpush3.bf16.msra.mxu1 %v3639_v7 }
 0x3b0   :  { %v2871_v17 = vadd.f32 %v2870_v14, %v2869_v13  ;;  %v2872_v11 = vpop.f32.mrb[86].mxu0  ;;  %3349 = vmatprep.subr.bf16.mxu1 %v3640_v10 }
 0x3b1   :  { %v2873_v18 = vpop.f32.mrb[87].mxu0 }
 0x3b2   :  { %v2874_v19 = vadd.f32 %v2873_v18, %v2872_v11 }
 0x3b3   :  { %3350 = vmatpush3.bf16.msra.mxu1 %v3640_v10 }
 0x3b4   :  { %v1299_v20 = vpack.c.bf16 %v2874_v19, %v2871_v17 }
 0x3b6   :  { %v2875_v16 = vpop.f32.mrb[88].mxu0  ;;  %3312 = vmatmul.mubr.bf16.gmra.mrb[40].mxu1 %v1299_v20 }
 0x3b7   :  { %v2876_v21 = vpop.f32.mrb[89].mxu0 }
 0x3b8   :  { %v2877_v25 = vadd.f32 %v2876_v21, %v2875_v16  ;;  %v2878_v15 = vpop.f32.mrb[90].mxu0 }
 0x3b9   :  { %v2879_v27 = vpop.f32.mrb[91].mxu0 }
 0x3ba   :  { %v2880_v29 = vadd.f32 %v2879_v27, %v2878_v15 }
 0x3bc   :  { %v1300_v23 = vpack.c.bf16 %v2880_v29, %v2877_v25 }
 0x3be   :  { %v2881_v24 = vpop.f32.mrb[92].mxu0  ;;  %3315 = vmatprep.mubr.bf16.mxu1 %v1300_v23 }
 0x3bf   :  { %v2882_v26 = vpop.f32.mrb[93].mxu0 }
 0x3c0   :  { %v2883_v28 = vadd.f32 %v2882_v26, %v2881_v24  ;;  %v2884_v30 = vpop.f32.mrb[94].mxu0 }
 0x3c1   :  { %v2885_v32 = vpop.f32.mrb[95].mxu0 }
 0x3c2   :  { %v2886_v34 = vadd.f32 %v2885_v32, %v2884_v30 }
 0x3c4   :  { %v1301_v36 = vpack.c.bf16 %v2886_v34, %v2883_v28  ;;  %v4207_v34 = vld [vmem:[%s4334_s5] ss:$0 sm:$0xff] }
 0x3c6   :  { %v2887_v38 = vpop.f32.mrb[96].mxu0  ;;  %3316 = vmatmul.mubr.bf16.gmra.mrb[44].mxu1 %v1301_v36 }
 0x3c7   :  { %v2888_v40 = vpop.f32.mrb[97].mxu0 }
 0x3c8   :  { %v2889_v42 = vadd.f32 %v2888_v40, %v2887_v38  ;;  %v2890_v43 = vpop.f32.mrb[98].mxu0 }
 0x3c9   :  { %v2891_v44 = vpop.f32.mrb[99].mxu0 }
 0x3ca   :  { %v2892_v45 = vadd.f32 %v2891_v44, %v2890_v43 }
 0x3cc   :  { %v1302_v46 = vpack.c.bf16 %v2892_v45, %v2889_v42 }
 0x3ce   :  { %v2893_v47 = vpop.f32.mrb[100].mxu0  ;;  %3319 = vmatprep.mubr.bf16.mxu1 %v1302_v46 }
 0x3cf   :  { %v2894_v48 = vpop.f32.mrb[101].mxu0 }
 0x3d0   :  { %v2895_v49 = vadd.f32 %v2894_v48, %v2893_v47  ;;  %v2896_v50 = vpop.f32.mrb[102].mxu0 }
 0x3d1   :  { %v2897_v52 = vpop.f32.mrb[103].mxu0 }
 0x3d2   :  { %v2898_v53 = vadd.f32 %v2897_v52, %v2896_v50 }
 0x3d4   :  { %v1303_v56 = vpack.c.bf16 %v2898_v53, %v2895_v49 }
 0x3d6   :  { %3320 = vmatmul.mubr.bf16.gmra.mrb[48].mxu1 %v1303_v56  ;;  %v2899_v57 = vpop.f32.mrb[104].mxu0 }
 0x3d7   :  { %v2900_v59 = vpop.f32.mrb[105].mxu0 }
 0x3d8   :  { %v2901_v60 = vadd.f32 %v2900_v59, %v2899_v57  ;;  %v2902_v61 = vpop.f32.mrb[106].mxu0 }
 0x3d9   :  { %v2903_v62 = vpop.f32.mrb[107].mxu0 }
 0x3da   :  { %v2904_v63 = vadd.f32 %v2903_v62, %v2902_v61 }
 0x3dc   :  { %v1304_v37 = vpack.c.bf16 %v2904_v63, %v2901_v60 }
 0x3de   :  { %v2905_v22 = vpop.f32.mrb[108].mxu0  ;;  %3323 = vmatprep.mubr.bf16.mxu1 %v1304_v37 }
 0x3df   :  { %v2906_v35 = vpop.f32.mrb[109].mxu0 }
 0x3e0   :  { %v2907_v41 = vadd.f32 %v2906_v35, %v2905_v22  ;;  %v2908_v51 = vpop.f32.mrb[110].mxu0 }
 0x3e1   :  { %v2909_v54 = vpop.f32.mrb[111].mxu0 }
 0x3e2   :  { %v2910_v55 = vadd.f32 %v2909_v54, %v2908_v51 }
 0x3e4   :  { %v1305_v1 = vpack.c.bf16 %v2910_v55, %v2907_v41 }
 0x3e6   :  { %3324 = vmatmul.mubr.bf16.gmra.mrb[52].mxu1 %v1305_v1  ;;  %v2911_v2 = vpop.f32.mrb[112].mxu0 }
 0x3e7   :  { %v2912_v3 = vpop.f32.mrb[113].mxu0 }
 0x3e8   :  { %v2913_v4 = vadd.f32 %v2912_v3, %v2911_v2  ;;  %v2914_v5 = vpop.f32.mrb[114].mxu0 }
 0x3e9   :  { %v2915_v0 = vpop.f32.mrb[115].mxu0 }
 0x3ea   :  { %v2916_v6 = vadd.f32 %v2915_v0, %v2914_v5 }
 0x3ec   :  { %v1306_v58 = vpack.c.bf16 %v2916_v6, %v2913_v4 }
 0x3ee   :  { %v2917_v8 = vpop.f32.mrb[116].mxu0  ;;  %3327 = vmatprep.mubr.bf16.mxu1 %v1306_v58 }
 0x3ef   :  { %v2918_v12 = vpop.f32.mrb[117].mxu0 }
 0x3f0   :  { %v2919_v13 = vadd.f32 %v2918_v12, %v2917_v8  ;;  %v2920_v14 = vpop.f32.mrb[118].mxu0 }
 0x3f1   :  { %v2921_v17 = vpop.f32.mrb[119].mxu0 }
 0x3f2   :  { %v2922_v11 = vadd.f32 %v2921_v17, %v2920_v14 }
 0x3f4   :  { %v1307_v18 = vpack.c.bf16 %v2922_v11, %v2919_v13 }
 0x3f6   :  { %3328 = vmatmul.mubr.bf16.gmra.mrb[56].mxu1 %v1307_v18  ;;  %v2923_v19 = vpop.f32.mrb[120].mxu0 }
 0x3f7   :  { %v2924_v20 = vpop.f32.mrb[121].mxu0 }
 0x3f8   :  { %v2925_v16 = vadd.f32 %v2924_v20, %v2923_v19  ;;  %v2926_v21 = vpop.f32.mrb[122].mxu0 }
 0x3f9   :  { %v2927_v25 = vpop.f32.mrb[123].mxu0 }
 0x3fa   :  { %v2928_v15 = vadd.f32 %v2927_v25, %v2926_v21 }
 0x3fc   :  { %v1308_v27 = vpack.c.bf16 %v2928_v15, %v2925_v16 }
 0x3fe   :  { %v2929_v29 = vpop.f32.mrb[124].mxu0  ;;  %3331 = vmatprep.mubr.bf16.mxu1 %v1308_v27 }
 0x3ff   :  { %v2930_v23 = vpop.f32.mrb[125].mxu0 }
 0x400   :  { %v2931_v24 = vadd.f32 %v2930_v23, %v2929_v29  ;;  %v2932_v26 = vpop.f32.mrb[126].mxu0 }
 0x401   :  { %v2933_v28 = vpop.f32.mrb[127].mxu0 }
 0x402   :  { %v2934_v30 = vadd.f32 %v2933_v28, %v2932_v26 }
 0x404   :  { %v1309_v32 = vpack.c.bf16 %v2934_v30, %v2931_v24 }
 0x406   :  { %3332 = vmatmul.mubr.bf16.gmra.mrb[60].mxu1 %v1309_v32 }
 0x469   :  { %v3305_v36 = vpop.f32.mrb[32].mxu1 }
 0x46a   :  { %v1769_v38 = vadd.f32 %v3305_v36, %v4207_v34  ;;  %v1633_v40 = vpop.f32.mrb[33].mxu1 }
 0x46b   :  { %v1767_v42 = vadd.f32 %v4207_v34, %v1633_v40  ;;  %v3306_v43 = vpop.f32.mrb[34].mxu1 }
 0x46c   :  { %v1770_v44 = vadd.f32 %v3306_v43, %v4207_v34  ;;  %v1636_v45 = vpop.f32.mrb[35].mxu1  ;;  %v1801_v47 = vmax.f32 %v1769_v38, 0.0 }
 0x46d   :  { %v1768_v46 = vadd.f32 %v4207_v34, %v1636_v45  ;;  %v1799_v49 = vmax.f32 %v1767_v42, 0.0 }
 0x46e   :  { %v1802_v48 = vmax.f32 %v1770_v44, 0.0 }
 0x46f   :  { %v1800_v50 = vmax.f32 %v1768_v46, 0.0 }
 0x470   :  { %v4213_v52 = vpack.c.bf16 %v1802_v48, %v1801_v47 }
 0x471   :  { %v4215_v53 = vpack.c.bf16 %v1800_v50, %v1799_v49 }
 0x473   :  { %3351 = vmatprep.mubr.bf16.mxu1 %v4215_v53 }
 0x474   :  { %3352 = vmatmul.mubr.bf16.vlgmr.msra.gmra.mrb[64].mxu1 %v4213_v52 }
 0x479   :  { %v3309_v56 = vpop.f32.mrb[36].mxu1 }
 0x47a   :  { %v1773_v57 = vadd.f32 %v3309_v56, %v4207_v34  ;;  %v1649_v59 = vpop.f32.mrb[37].mxu1 }
 0x47b   :  { %v1771_v60 = vadd.f32 %v4207_v34, %v1649_v59  ;;  %v3310_v61 = vpop.f32.mrb[38].mxu1 }
 0x47c   :  { %v1774_v62 = vadd.f32 %v3310_v61, %v4207_v34  ;;  %v1652_v63 = vpop.f32.mrb[39].mxu1  ;;  %v1805_v22 = vmax.f32 %v1773_v57, 0.0 }
 0x47d   :  { %v1772_v37 = vadd.f32 %v4207_v34, %v1652_v63  ;;  %v1803_v41 = vmax.f32 %v1771_v60, 0.0 }
 0x47e   :  { %v1806_v35 = vmax.f32 %v1774_v62, 0.0 }
 0x47f   :  { %v1804_v51 = vmax.f32 %v1772_v37, 0.0 }
 0x480   :  { %v4223_v54 = vpack.c.bf16 %v1806_v35, %v1805_v22 }
 0x481   :  { %v4225_v55 = vpack.c.bf16 %v1804_v51, %v1803_v41 }
 0x483   :  { %3355 = vmatprep.mubr.bf16.mxu1 %v4225_v55 }
 0x484   :  { %3356 = vmatmul.mubr.bf16.gmra.mrb[68].mxu1 %v4223_v54 }
 0x489   :  { %v3313_v1 = vpop.f32.mrb[40].mxu1 }
 0x48a   :  { %v1777_v2 = vadd.f32 %v3313_v1, %v4207_v34  ;;  %v1665_v3 = vpop.f32.mrb[41].mxu1 }
 0x48b   :  { %v1775_v4 = vadd.f32 %v4207_v34, %v1665_v3  ;;  %v3314_v5 = vpop.f32.mrb[42].mxu1 }
 0x48c   :  { %v1778_v0 = vadd.f32 %v3314_v5, %v4207_v34  ;;  %v1668_v6 = vpop.f32.mrb[43].mxu1  ;;  %v1809_v58 = vmax.f32 %v1777_v2, 0.0 }
 0x48d   :  { %v1776_v7 = vadd.f32 %v4207_v34, %v1668_v6  ;;  %v1807_v10 = vmax.f32 %v1775_v4, 0.0 }
 0x48e   :  { %v1810_v8 = vmax.f32 %v1778_v0, 0.0 }
 0x48f   :  { %v1808_v12 = vmax.f32 %v1776_v7, 0.0 }
 0x490   :  { %v4233_v13 = vpack.c.bf16 %v1810_v8, %v1809_v58 }
 0x491   :  { %v4235_v14 = vpack.c.bf16 %v1808_v12, %v1807_v10 }
 0x493   :  { %3359 = vmatprep.mubr.bf16.mxu1 %v4235_v14 }
 0x494   :  { %3360 = vmatmul.mubr.bf16.gmra.mrb[72].mxu1 %v4233_v13 }
 0x499   :  { %v3317_v17 = vpop.f32.mrb[44].mxu1 }
 0x49a   :  { %v1781_v11 = vadd.f32 %v3317_v17, %v4207_v34  ;;  %v1681_v18 = vpop.f32.mrb[45].mxu1 }
 0x49b   :  { %v1779_v19 = vadd.f32 %v4207_v34, %v1681_v18  ;;  %v3318_v20 = vpop.f32.mrb[46].mxu1 }
 0x49c   :  { %v1782_v16 = vadd.f32 %v3318_v20, %v4207_v34  ;;  %v1684_v21 = vpop.f32.mrb[47].mxu1  ;;  %v1813_v15 = vmax.f32 %v1781_v11, 0.0 }
 0x49d   :  { %v1780_v25 = vadd.f32 %v4207_v34, %v1684_v21  ;;  %v1811_v29 = vmax.f32 %v1779_v19, 0.0 }
 0x49e   :  { %v1814_v27 = vmax.f32 %v1782_v16, 0.0 }
 0x49f   :  { %v1812_v23 = vmax.f32 %v1780_v25, 0.0 }
 0x4a0   :  { %v4243_v24 = vpack.c.bf16 %v1814_v27, %v1813_v15 }
 0x4a1   :  { %v4245_v26 = vpack.c.bf16 %v1812_v23, %v1811_v29 }
 0x4a3   :  { %3363 = vmatprep.mubr.bf16.mxu1 %v4245_v26 }
 0x4a4   :  { %3364 = vmatmul.mubr.bf16.gmra.mrb[76].mxu1 %v4243_v24 }
 0x4a9   :  { %v3321_v28 = vpop.f32.mrb[48].mxu1 }
 0x4aa   :  { %v1785_v30 = vadd.f32 %v3321_v28, %v4207_v34  ;;  %v1697_v32 = vpop.f32.mrb[49].mxu1  ;;  %v3642_v28 = vld [vmem:[#allocation10 + $0x8] sm:$0xff]  }
 0x4ab   :  { %v1783_v36 = vadd.f32 %v4207_v34, %v1697_v32  ;;  %v3322_v38 = vpop.f32.mrb[50].mxu1  ;;  %v3645_v32 = vld [vmem:[#allocation10 + $0x20] sm:$0xff]  }
 0x4ac   :  { %v1786_v40 = vadd.f32 %v3322_v38, %v4207_v34  ;;  %v1700_v42 = vpop.f32.mrb[51].mxu1  ;;  %v1817_v44 = vmax.f32 %v1785_v30, 0.0  ;;  %v3643_v30 = vld [vmem:[#allocation10 + $0x10] sm:$0xff]   ;;  %v3658_v38 = vld [vmem:[#allocation2 + $0x40] ss:$8 sps:$4 sm:$0xff]  }
 0x4ad   :  { %v1784_v43 = vadd.f32 %v4207_v34, %v1700_v42  ;;  %v1815_v46 = vmax.f32 %v1783_v36, 0.0  ;;  %v3656_v36 = vld [vmem:[#allocation2 + $0x30] ss:$8 sps:$4 sm:$0xff]   ;;  %v3661_v42 = vld [vmem:[#allocation2 + $0x64] ss:$8 sps:$4 sm:$0xff]  }
 0x4ae   :  { %v1818_v45 = vmax.f32 %v1786_v40, 0.0  ;;  %v3660_v40 = vld [vmem:[#allocation2 + $0x50] ss:$8 sps:$4 sm:$0xff]  }
 0x4af   :  { %v1816_v47 = vmax.f32 %v1784_v43, 0.0  ;;  %v3664_v43 = vld [vmem:[#allocation2 + $0x70] ss:$8 sps:$4 sm:$0xff]  }
 0x4b0   :  { %v1840_v48 = vpack.c.bf16 %v1818_v45, %v1817_v44  ;;  %v3665_v44 = vld [vmem:[#allocation2 + $0x84] ss:$8 sps:$4 sm:$0xff]   ;;  %v3666_v45 = vld [vmem:[#allocation2 + $0x80] ss:$8 sps:$4 sm:$0xff]  }
 0x4b1   :  { %v1839_v49 = vpack.c.bf16 %v1816_v47, %v1815_v46  ;;  %v3667_v46 = vld [vmem:[#allocation2 + $0x94] ss:$8 sps:$4 sm:$0xff]   ;;  %v3668_v47 = vld [vmem:[#allocation2 + $0x90] ss:$8 sps:$4 sm:$0xff]  }
 0x4b3   :  { %2983 = vmatprep.subr.bf16.mxu0 %v1839_v49  ;;  %3367 = vmatprep.mubr.bf16.mxu1 %v1839_v49  ;;  %v3670_v49 = vld [vmem:[#allocation2 + $0xa0] ss:$8 sps:$4 sm:$0xff]  }
 0x4b4   :  { %2984 = vmatpush3.bf16.msra.mxu0 %v4215_v53  ;;  %3368 = vmatmul.mubr.bf16.gmra.mrb[80].mxu1 %v1840_v48 }
 0x4b5   :  { %2985 = vmatprep.subr.bf16.mxu0 %v1840_v48  ;;  %v3669_v48 = vld [vmem:[#allocation2 + $0xa4] ss:$8 sps:$4 sm:$0xff]  }
 0x4b8   :  { %2986 = vmatpush3.bf16.msra.mxu0 %v4213_v52 }
 0x4b9   :  { %v3325_v50 = vpop.f32.mrb[52].mxu1 }
 0x4ba   :  { %v1789_v56 = vadd.f32 %v3325_v50, %v4207_v34  ;;  %v1713_v57 = vpop.f32.mrb[53].mxu1  ;;  %v3671_v50 = vld [vmem:[#allocation2 + $0xb4] ss:$8 sps:$4 sm:$0xff]  }
 0x4bb   :  { %v1787_v59 = vadd.f32 %v4207_v34, %v1713_v57  ;;  %v3326_v60 = vpop.f32.mrb[54].mxu1  ;;  %v3672_v57 = vld [vmem:[#allocation2 + $0xb0] ss:$8 sps:$4 sm:$0xff]  }
 0x4bc   :  { %v1790_v61 = vadd.f32 %v3326_v60, %v4207_v34  ;;  %v1716_v62 = vpop.f32.mrb[55].mxu1  ;;  %v1821_v37 = vmax.f32 %v1789_v56, 0.0  ;;  %v3646_v56 = vld [vmem:[#allocation10 + $0x28] sm:$0xff]   ;;  %v3647_v60 = vld [vmem:[#allocation10 + $0x30] sm:$0xff]  }
 0x4bd   :  { %v1788_v63 = vadd.f32 %v4207_v34, %v1716_v62  ;;  %v1819_v35 = vmax.f32 %v1787_v59, 0.0  ;;  %v3673_v59 = vld [vmem:[#allocation2 + $0xc4] ss:$8 sps:$4 sm:$0xff]   ;;  %v3674_v62 = vld [vmem:[#allocation2 + $0xc0] ss:$8 sps:$4 sm:$0xff]  }
 0x4be   :  { %v1822_v22 = vmax.f32 %v1790_v61, 0.0  ;;  %v3648_v61 = vld [vmem:[#allocation10 + $0x38] sm:$0xff]  }
 0x4bf   :  { %v1820_v53 = vmax.f32 %v1788_v63, 0.0  ;;  %v3675_v63 = vld [vmem:[#allocation2 + $0xd4] ss:$8 sps:$4 sm:$0xff]  }
 0x4c0   :  { %v1842_v41 = vpack.c.bf16 %v1822_v22, %v1821_v37  ;;  %v3676_v37 = vld [vmem:[#allocation2 + $0xd0] ss:$8 sps:$4 sm:$0xff]   ;;  %v3677_v22 = vld [vmem:[#allocation2 + $0xe4] ss:$8 sps:$4 sm:$0xff]  }
 0x4c1   :  { %v1841_v51 = vpack.c.bf16 %v1820_v53, %v1819_v35  ;;  %v3678_v35 = vld [vmem:[#allocation2 + $0xe0] ss:$8 sps:$4 sm:$0xff]   ;;  %v3679_v53 = vld [vmem:[#allocation2 + $0xf4] ss:$8 sps:$4 sm:$0xff]  }
 0x4c3   :  { %2987 = vmatprep.subr.bf16.mxu0 %v1841_v51  ;;  %3371 = vmatprep.mubr.bf16.mxu1 %v1841_v51 }
 0x4c4   :  { %2988 = vmatpush3.bf16.msra.mxu0 %v4225_v55  ;;  %3372 = vmatmul.mubr.bf16.gmra.mrb[84].mxu1 %v1842_v41 }
 0x4c5   :  { %2989 = vmatprep.subr.bf16.mxu0 %v1842_v41  ;;  %v3680_v41 = vld [vmem:[#allocation2 + $0xf0] ss:$8 sps:$4 sm:$0xff]  }
 0x4c8   :  { %2990 = vmatpush3.bf16.msra.mxu0 %v4223_v54 }
 0x4c9   :  { %v3329_v52 = vpop.f32.mrb[56].mxu1 }
 0x4ca   :  { %v1793_v1 = vadd.f32 %v3329_v52, %v4207_v34  ;;  %v1729_v2 = vpop.f32.mrb[57].mxu1 }
 0x4cb   :  { %v1791_v3 = vadd.f32 %v4207_v34, %v1729_v2  ;;  %v3330_v4 = vpop.f32.mrb[58].mxu1 }
 0x4cc   :  { %v1794_v5 = vadd.f32 %v3330_v4, %v4207_v34  ;;  %v1732_v0 = vpop.f32.mrb[59].mxu1  ;;  %v1825_v7 = vmax.f32 %v1793_v1, 0.0 }
 0x4cd   :  { %v1792_v6 = vadd.f32 %v4207_v34, %v1732_v0  ;;  %v1823_v8 = vmax.f32 %v1791_v3, 0.0 }
 0x4ce   :  { %v1826_v58 = vmax.f32 %v1794_v5, 0.0 }
 0x4cf   :  { %v1824_v55 = vmax.f32 %v1792_v6, 0.0 }
 0x4d0   :  { %v1844_v10 = vpack.c.bf16 %v1826_v58, %v1825_v7 }
 0x4d1   :  { %v1843_v12 = vpack.c.bf16 %v1824_v55, %v1823_v8 }
 0x4d3   :  { %2991 = vmatprep.subr.bf16.mxu0 %v1843_v12  ;;  %3375 = vmatprep.mubr.bf16.mxu1 %v1843_v12 }
 0x4d4   :  { %2992 = vmatpush3.bf16.msra.mxu0 %v4235_v14  ;;  %3376 = vmatmul.mubr.bf16.gmra.mrb[88].mxu1 %v1844_v10 }
 0x4d5   :  { %2993 = vmatprep.subr.bf16.mxu0 %v1844_v10 }
 0x4d8   :  { %2994 = vmatpush3.bf16.msra.mxu0 %v4233_v13  ;;  %v3641_v13 = vld [vmem:[#allocation10] sm:$0xff]  }
 0x4d9   :  { %v3333_v54 = vpop.f32.mrb[60].mxu1  ;;  %3383 = vmatprep.subr.bf16.mxu1 %v3641_v13 }
 0x4da   :  { %v1797_v17 = vadd.f32 %v3333_v54, %v4207_v34  ;;  %v1745_v11 = vpop.f32.mrb[61].mxu1  ;;  %3384 = vmatpush3.bf16.msra.mxu1 %v3641_v13 }
 0x4db   :  { %v1795_v18 = vadd.f32 %v4207_v34, %v1745_v11  ;;  %v3334_v19 = vpop.f32.mrb[62].mxu1  ;;  %3385 = vmatprep.subr.bf16.mxu1 %v3642_v28 }
 0x4dc   :  { %v1798_v20 = vadd.f32 %v3334_v19, %v4207_v34  ;;  %v1748_v16 = vpop.f32.mrb[63].mxu1  ;;  %v1829_v25 = vmax.f32 %v1797_v17, 0.0 }
 0x4dd   :  { %v1796_v21 = vadd.f32 %v4207_v34, %v1748_v16  ;;  %v1827_v27 = vmax.f32 %v1795_v18, 0.0  ;;  %v3644_v34 = vld [vmem:[#allocation10 + $0x18] sm:$0xff]  }
 0x4de   :  { %v1830_v15 = vmax.f32 %v1798_v20, 0.0  ;;  %3386 = vmatpush3.bf16.msra.mxu1 %v3642_v28 }
 0x4df   :  { %v1828_v14 = vmax.f32 %v1796_v21, 0.0  ;;  %3387 = vmatprep.subr.bf16.mxu1 %v3643_v30 }
 0x4e0   :  { %v1846_v29 = vpack.c.bf16 %v1830_v15, %v1829_v25 }
 0x4e1   :  { %v1845_v23 = vpack.c.bf16 %v1828_v14, %v1827_v27 }
 0x4e2   :  { %3388 = vmatpush3.bf16.msra.mxu1 %v3643_v30 }
 0x4e3   :  { %2995 = vmatprep.subr.bf16.mxu0 %v1845_v23  ;;  %3379 = vmatprep.mubr.bf16.mxu1 %v1845_v23 }
 0x4e4   :  { %2996 = vmatpush3.bf16.msra.mxu0 %v4245_v26  ;;  %3380 = vmatmul.mubr.bf16.gmra.mrb[92].mxu1 %v1846_v29  ;;  %v3654_v26 = vld [vmem:[#allocation2 + $0x20] ss:$8 sps:$4 sm:$0xff]  }
 0x4e5   :  { %2997 = vmatprep.subr.bf16.mxu0 %v1846_v29  ;;  %3389 = vmatprep.subr.bf16.mxu1 %v3644_v34 }
 0x4e6   :  { %3390 = vmatpush3.bf16.msra.mxu1 %v3644_v34 }
 0x4e7   :  { %3391 = vmatprep.subr.bf16.mxu1 %v3645_v32 }
 0x4e8   :  { %2998 = vmatpush3.bf16.msra.mxu0 %v4243_v24  ;;  %v3655_v24 = vld [vmem:[#allocation2 + $0x34] ss:$8 sps:$4 sm:$0xff]  }
 0x4ea   :  { %3392 = vmatpush3.bf16.msra.mxu1 %v3645_v32 }
 0x4eb   :  { %1880 = vmatmul.mubr.bf16.vlgmr.msra.gmra.mrb[128].mxu0 %v4165_v9  ;;  %v3657_v9 = vld [vmem:[#allocation2 + $0x44] ss:$8 sps:$4 sm:$0xff]   ;;  %3393 = vmatprep.subr.bf16.mxu1 %v3646_v56 }
 0x4ec   :  { %1887 = vmatprep.mubr.bf16.mxu0 %v4168_v31  ;;  %v3659_v31 = vld [vmem:[#allocation2 + $0x54] ss:$8 sps:$4 sm:$0xff]  }
 0x4ee   :  { %3394 = vmatpush3.bf16.msra.mxu1 %v3646_v56 }
 0x4ef   :  { %3395 = vmatprep.subr.bf16.mxu1 %v3647_v60 }
 0x4f2   :  { %3396 = vmatpush3.bf16.msra.mxu1 %v3647_v60 }
 0x4f3   :  { %1888 = vmatmul.mubr.bf16.gmra.mrb[132].mxu0 %v4171_v39  ;;  %v3662_v39 = vld [vmem:[#allocation2 + $0x60] ss:$8 sps:$4 sm:$0xff]   ;;  %3397 = vmatprep.subr.bf16.mxu1 %v3648_v61 }
 0x4f4   :  { %1895 = vmatprep.mubr.bf16.mxu0 %v4174_v33  ;;  %v3663_v33 = vld [vmem:[#allocation2 + $0x74] ss:$8 sps:$4 sm:$0xff]  }
 0x4f6   :  { %3398 = vmatpush3.bf16.msra.mxu1 %v3648_v61 }
 0x4fb   :  { %1896 = vmatmul.mubr.bf16.gmra.mrb[136].mxu0 %v3654_v26 }
 0x4fc   :  { %1903 = vmatprep.mubr.bf16.mxu0 %v3655_v24 }
 0x503   :  { %1904 = vmatmul.mubr.bf16.gmra.mrb[140].mxu0 %v3656_v36 }
 0x504   :  { %1911 = vmatprep.mubr.bf16.mxu0 %v3657_v9 }
 0x50b   :  { %1912 = vmatmul.mubr.bf16.gmra.mrb[144].mxu0 %v3658_v38 }
 0x50c   :  { %1919 = vmatprep.mubr.bf16.mxu0 %v3659_v31 }
 0x513   :  { %1920 = vmatmul.mubr.bf16.gmra.mrb[148].mxu0 %v3660_v40 }
 0x514   :  { %1927 = vmatprep.mubr.bf16.mxu0 %v3661_v42 }
 0x51b   :  { %1928 = vmatmul.mubr.bf16.gmra.mrb[152].mxu0 %v3662_v39 }
 0x51c   :  { %1935 = vmatprep.mubr.bf16.mxu0 %v3663_v33 }
 0x523   :  { %1936 = vmatmul.mubr.bf16.gmra.mrb[156].mxu0 %v3664_v43 }
 0x524   :  { %1943 = vmatprep.mubr.bf16.mxu0 %v3665_v44 }
 0x52b   :  { %1944 = vmatmul.mubr.bf16.gmra.mrb[160].mxu0 %v3666_v45 }
 0x52c   :  { %1951 = vmatprep.mubr.bf16.mxu0 %v3667_v46 }
 0x533   :  { %1952 = vmatmul.mubr.bf16.gmra.mrb[164].mxu0 %v3668_v47 }
 0x534   :  { %1959 = vmatprep.mubr.bf16.mxu0 %v3669_v48 }
 0x53b   :  { %1960 = vmatmul.mubr.bf16.gmra.mrb[168].mxu0 %v3670_v49 }
 0x53c   :  { %1967 = vmatprep.mubr.bf16.mxu0 %v3671_v50 }
 0x543   :  { %1968 = vmatmul.mubr.bf16.gmra.mrb[172].mxu0 %v3672_v57 }
 0x544   :  { %1975 = vmatprep.mubr.bf16.mxu0 %v3673_v59 }
 0x54b   :  { %1976 = vmatmul.mubr.bf16.gmra.mrb[176].mxu0 %v3674_v62 }
 0x54c   :  { %1983 = vmatprep.mubr.bf16.mxu0 %v3675_v63 }
 0x553   :  { %1984 = vmatmul.mubr.bf16.gmra.mrb[180].mxu0 %v3676_v37 }
 0x554   :  { %1991 = vmatprep.mubr.bf16.mxu0 %v3677_v22 }
 0x55b   :  { %1992 = vmatmul.mubr.bf16.gmra.mrb[184].mxu0 %v3678_v35 }
 0x55c   :  { %1999 = vmatprep.mubr.bf16.mxu0 %v3679_v53 }
 0x563   :  { %2000 = vmatmul.mubr.bf16.gmra.mrb[188].mxu0 %v3680_v41 }
 0x5be   :  { %v2999_v51 = vpop.f32.mrb[128].mxu0 }
 0x5bf   :  { %v3000_v52 = vpop.f32.mrb[129].mxu0 }
 0x5c0   :  { %v3001_v1 = vadd.f32 %v3000_v52, %v2999_v51  ;;  %v3002_v2 = vpop.f32.mrb[130].mxu0 }
 0x5c1   :  { %v3003_v3 = vpop.f32.mrb[131].mxu0 }
 0x5c2   :  { %v3004_v4 = vadd.f32 %v3003_v3, %v3002_v2 }
 0x5c4   :  { %v2008_v5 = vpack.c.bf16 %v3004_v4, %v3001_v1 }
 0x5c6   :  { %v3005_v0 = vpop.f32.mrb[132].mxu0  ;;  %3399 = vmatprep.mubr.bf16.mxu1 %v2008_v5 }
 0x5c7   :  { %v3006_v6 = vpop.f32.mrb[133].mxu0 }
 0x5c8   :  { %v3007_v7 = vadd.f32 %v3006_v6, %v3005_v0  ;;  %v3008_v58 = vpop.f32.mrb[134].mxu0 }
 0x5c9   :  { %v3009_v8 = vpop.f32.mrb[135].mxu0 }
 0x5ca   :  { %v3010_v55 = vadd.f32 %v3009_v8, %v3008_v58 }
 0x5cc   :  { %v2009_v10 = vpack.c.bf16 %v3010_v55, %v3007_v7 }
 0x5ce   :  { %3400 = vmatmul.mubr.bf16.vlgmr.msra.gmra.mrb[64].mxu1 %v2009_v10  ;;  %v3011_v12 = vpop.f32.mrb[136].mxu0 }
 0x5cf   :  { %v3012_v54 = vpop.f32.mrb[137].mxu0 }
 0x5d0   :  { %v3013_v17 = vadd.f32 %v3012_v54, %v3011_v12  ;;  %v3014_v11 = vpop.f32.mrb[138].mxu0 }
 0x5d1   :  { %v3015_v18 = vpop.f32.mrb[139].mxu0 }
 0x5d2   :  { %v3016_v19 = vadd.f32 %v3015_v18, %v3014_v11 }
 0x5d4   :  { %v2010_v20 = vpack.c.bf16 %v3016_v19, %v3013_v17 }
 0x5d6   :  { %v3017_v16 = vpop.f32.mrb[140].mxu0  ;;  %3403 = vmatprep.mubr.bf16.mxu1 %v2010_v20 }
 0x5d7   :  { %v3018_v21 = vpop.f32.mrb[141].mxu0 }
 0x5d8   :  { %v3019_v25 = vadd.f32 %v3018_v21, %v3017_v16  ;;  %v3020_v15 = vpop.f32.mrb[142].mxu0 }
 0x5d9   :  { %v3021_v27 = vpop.f32.mrb[143].mxu0 }
 0x5da   :  { %v3022_v14 = vadd.f32 %v3021_v27, %v3020_v15 }
 0x5dc   :  { %v2011_v29 = vpack.c.bf16 %v3022_v14, %v3019_v25 }
 0x5de   :  { %3404 = vmatmul.mubr.bf16.gmra.mrb[68].mxu1 %v2011_v29  ;;  %v3023_v23 = vpop.f32.mrb[144].mxu0 }
 0x5df   :  { %v3024_v13 = vpop.f32.mrb[145].mxu0 }
 0x5e0   :  { %v3025_v28 = vadd.f32 %v3024_v13, %v3023_v23  ;;  %v3026_v30 = vpop.f32.mrb[146].mxu0 }
 0x5e1   :  { %v3027_v34 = vpop.f32.mrb[147].mxu0 }
 0x5e2   :  { %v3028_v32 = vadd.f32 %v3027_v34, %v3026_v30 }
 0x5e4   :  { %v2012_v26 = vpack.c.bf16 %v3028_v32, %v3025_v28 }
 0x5e6   :  { %v3029_v24 = vpop.f32.mrb[148].mxu0  ;;  %3407 = vmatprep.mubr.bf16.mxu1 %v2012_v26 }
 0x5e7   :  { %v3030_v36 = vpop.f32.mrb[149].mxu0 }
 0x5e8   :  { %v3031_v9 = vadd.f32 %v3030_v36, %v3029_v24  ;;  %v3032_v38 = vpop.f32.mrb[150].mxu0 }
 0x5e9   :  { %v3033_v31 = vpop.f32.mrb[151].mxu0 }
 0x5ea   :  { %v3034_v40 = vadd.f32 %v3033_v31, %v3032_v38 }
 0x5ec   :  { %v2013_v42 = vpack.c.bf16 %v3034_v40, %v3031_v9 }
 0x5ee   :  { %3408 = vmatmul.mubr.bf16.gmra.mrb[72].mxu1 %v2013_v42  ;;  %v3035_v39 = vpop.f32.mrb[152].mxu0 }
 0x5ef   :  { %v3036_v33 = vpop.f32.mrb[153].mxu0 }
 0x5f0   :  { %v3037_v43 = vadd.f32 %v3036_v33, %v3035_v39  ;;  %v3038_v44 = vpop.f32.mrb[154].mxu0 }
 0x5f1   :  { %v3039_v45 = vpop.f32.mrb[155].mxu0 }
 0x5f2   :  { %v3040_v46 = vadd.f32 %v3039_v45, %v3038_v44 }
 0x5f4   :  { %v2014_v47 = vpack.c.bf16 %v3040_v46, %v3037_v43 }
 0x5f6   :  { %v3041_v48 = vpop.f32.mrb[156].mxu0  ;;  %3411 = vmatprep.mubr.bf16.mxu1 %v2014_v47  ;;  %v4280_v47 = vld [vmem:[%s4336_s7] ss:$0 sm:$0xff]  ;;  %s3830_s7 = smov [#allocation11]  }
 0x5f7   :  { %v3042_v49 = vpop.f32.mrb[157].mxu0  ;;  %s2550_s27 = sshll.u32 %s3830_s7, 4  ;;  %s2551_s27 = int_to_ptr.vmem [resolvable:$true] %s2550_s27 }
 0x5f8   :  { %v3043_v50 = vadd.f32 %v3042_v49, %v3041_v48  ;;  %v3044_v56 = vpop.f32.mrb[158].mxu0  ;;  %s3791_s29 = scalar_lea.vmem %s2551_s27, 4096  ;;  %p3796_p13 = scmp.lt.s32.totalorder %s2551_s27, %s2551_s27 }
 0x5f9   :  { %v3045_v57 = vpop.f32.mrb[159].mxu0  ;;  %p3792_p12 = scmp.ne.s32.totalorder %s2551_s27, %s3791_s29  ;;  %p3797_p0 = scmp.lt.s32.totalorder %s3791_s29, %s3791_s29 }
 0x5fa   :  { %v3046_v59 = vadd.f32 %v3045_v57, %v3044_v56 }
 0x5fb   :  { %p3798_p1 = por %p3797_p0, %p3796_p13 }
 0x5fc   :  { %v2015_v60 = vpack.c.bf16 %v3046_v59, %v3043_v50 }
 0x5fd   :  { %p3799_p2 = pnand %p3798_p1, %p3792_p12 }
 0x5fe   :  { %3412 = vmatmul.mubr.bf16.gmra.mrb[76].mxu1 %v2015_v60  ;;  %v3047_v61 = vpop.f32.mrb[160].mxu0 }
 0x5ff   :  { %v3048_v62 = vpop.f32.mrb[161].mxu0 }
 0x600   :  { %v3049_v63 = vadd.f32 %v3048_v62, %v3047_v61  ;;  %v3050_v37 = vpop.f32.mrb[162].mxu0 }
 0x601   :  { %v3051_v22 = vpop.f32.mrb[163].mxu0 }
 0x602   :  { %v3052_v35 = vadd.f32 %v3051_v22, %v3050_v37 }
 0x604   :  { %v2016_v53 = vpack.c.bf16 %v3052_v35, %v3049_v63 }
 0x606   :  { %v3053_v41 = vpop.f32.mrb[164].mxu0  ;;  %3415 = vmatprep.mubr.bf16.mxu1 %v2016_v53 }
 0x607   :  { %v3054_v51 = vpop.f32.mrb[165].mxu0 }
 0x608   :  { %v3055_v52 = vadd.f32 %v3054_v51, %v3053_v41  ;;  %v3056_v1 = vpop.f32.mrb[166].mxu0 }
 0x609   :  { %v3057_v2 = vpop.f32.mrb[167].mxu0 }
 0x60a   :  { %v3058_v3 = vadd.f32 %v3057_v2, %v3056_v1 }
 0x60c   :  { %v2017_v4 = vpack.c.bf16 %v3058_v3, %v3055_v52 }
 0x60e   :  { %3416 = vmatmul.mubr.bf16.gmra.mrb[80].mxu1 %v2017_v4  ;;  %v3059_v5 = vpop.f32.mrb[168].mxu0 }
 0x60f   :  { %v3060_v0 = vpop.f32.mrb[169].mxu0 }
 0x610   :  { %v3061_v6 = vadd.f32 %v3060_v0, %v3059_v5  ;;  %v3062_v7 = vpop.f32.mrb[170].mxu0 }
 0x611   :  { %v3063_v58 = vpop.f32.mrb[171].mxu0 }
 0x612   :  { %v3064_v8 = vadd.f32 %v3063_v58, %v3062_v7 }
 0x614   :  { %v2018_v55 = vpack.c.bf16 %v3064_v8, %v3061_v6 }
 0x616   :  { %v3065_v10 = vpop.f32.mrb[172].mxu0  ;;  %3419 = vmatprep.mubr.bf16.mxu1 %v2018_v55 }
 0x617   :  { %v3066_v12 = vpop.f32.mrb[173].mxu0 }
 0x618   :  { %v3067_v54 = vadd.f32 %v3066_v12, %v3065_v10  ;;  %v3068_v17 = vpop.f32.mrb[174].mxu0 }
 0x619   :  { %v3069_v11 = vpop.f32.mrb[175].mxu0 }
 0x61a   :  { %v3070_v18 = vadd.f32 %v3069_v11, %v3068_v17 }
 0x61c   :  { %v2019_v19 = vpack.c.bf16 %v3070_v18, %v3067_v54 }
 0x61e   :  { %3420 = vmatmul.mubr.bf16.gmra.mrb[84].mxu1 %v2019_v19  ;;  %v3071_v20 = vpop.f32.mrb[176].mxu0 }
 0x61f   :  { %v3072_v16 = vpop.f32.mrb[177].mxu0 }
 0x620   :  { %v3073_v21 = vadd.f32 %v3072_v16, %v3071_v20  ;;  %v3074_v25 = vpop.f32.mrb[178].mxu0 }
 0x621   :  { %v3075_v15 = vpop.f32.mrb[179].mxu0 }
 0x622   :  { %v3076_v27 = vadd.f32 %v3075_v15, %v3074_v25 }
 0x624   :  { %v2020_v14 = vpack.c.bf16 %v3076_v27, %v3073_v21 }
 0x626   :  { %v3077_v29 = vpop.f32.mrb[180].mxu0  ;;  %3423 = vmatprep.mubr.bf16.mxu1 %v2020_v14 }
 0x627   :  { %v3078_v23 = vpop.f32.mrb[181].mxu0 }
 0x628   :  { %v3079_v13 = vadd.f32 %v3078_v23, %v3077_v29  ;;  %v3080_v28 = vpop.f32.mrb[182].mxu0 }
 0x629   :  { %v3081_v30 = vpop.f32.mrb[183].mxu0 }
 0x62a   :  { %v3082_v34 = vadd.f32 %v3081_v30, %v3080_v28 }
 0x62c   :  { %v2021_v32 = vpack.c.bf16 %v3082_v34, %v3079_v13 }
 0x62e   :  { %3424 = vmatmul.mubr.bf16.gmra.mrb[88].mxu1 %v2021_v32  ;;  %v3083_v26 = vpop.f32.mrb[184].mxu0 }
 0x62f   :  { %v3084_v24 = vpop.f32.mrb[185].mxu0 }
 0x630   :  { %v3085_v36 = vadd.f32 %v3084_v24, %v3083_v26  ;;  %v3086_v9 = vpop.f32.mrb[186].mxu0 }
 0x631   :  { %v3087_v38 = vpop.f32.mrb[187].mxu0 }
 0x632   :  { %v3088_v31 = vadd.f32 %v3087_v38, %v3086_v9 }
 0x634   :  { %v2022_v40 = vpack.c.bf16 %v3088_v31, %v3085_v36 }
 0x636   :  { %v3089_v42 = vpop.f32.mrb[188].mxu0  ;;  %3427 = vmatprep.mubr.bf16.mxu1 %v2022_v40 }
 0x637   :  { %v3090_v39 = vpop.f32.mrb[189].mxu0 }
 0x638   :  { %v3091_v33 = vadd.f32 %v3090_v39, %v3089_v42  ;;  %v3092_v43 = vpop.f32.mrb[190].mxu0 }
 0x639   :  { %v3093_v44 = vpop.f32.mrb[191].mxu0 }
 0x63a   :  { %v3094_v45 = vadd.f32 %v3093_v44, %v3092_v43 }
 0x63c   :  { %v2023_v46 = vpack.c.bf16 %v3094_v45, %v3091_v33 }
 0x63e   :  { %3428 = vmatmul.mubr.bf16.gmra.mrb[92].mxu1 %v2023_v46 }
 0x6a1   :  { %v3401_v48 = vpop.f32.mrb[64].mxu1 }
 0x6a2   :  { %v2483_v49 = vadd.f32 %v3401_v48, %v4280_v47  ;;  %v2347_v50 = vpop.f32.mrb[65].mxu1 }
 0x6a3   :  { %v2481_v56 = vadd.f32 %v4280_v47, %v2347_v50  ;;  %v3402_v57 = vpop.f32.mrb[66].mxu1 }
 0x6a4   :  { %2515 = vst [vmem:[#allocation11 + $0x10] sm:$0xff] %v2483_v49  ;;  %v2484_v59 = vadd.f32 %v3402_v57, %v4280_v47  ;;  %v2350_v60 = vpop.f32.mrb[67].mxu1 }
 0x6a5   :  { %2513 = vst [vmem:[#allocation11] sm:$0xff] %v2481_v56  ;;  %v2482_v61 = vadd.f32 %v4280_v47, %v2350_v60 }
 0x6a6   :  { %2516 = vst [vmem:[#allocation11 + $0x18] sm:$0xff] %v2484_v59 }
 0x6a7   :  { %2514 = vst [vmem:[#allocation11 + $0x8] sm:$0xff] %v2482_v61 }
 0x6b1   :  { %v3405_v62 = vpop.f32.mrb[68].mxu1 }
 0x6b2   :  { %v2487_v63 = vadd.f32 %v3405_v62, %v4280_v47  ;;  %v2363_v37 = vpop.f32.mrb[69].mxu1 }
 0x6b3   :  { %v2485_v22 = vadd.f32 %v4280_v47, %v2363_v37  ;;  %v3406_v35 = vpop.f32.mrb[70].mxu1 }
 0x6b4   :  { %2519 = vst [vmem:[#allocation11 + $0x30] sm:$0xff] %v2487_v63  ;;  %v2488_v53 = vadd.f32 %v3406_v35, %v4280_v47  ;;  %v2366_v41 = vpop.f32.mrb[71].mxu1 }
 0x6b5   :  { %2517 = vst [vmem:[#allocation11 + $0x20] sm:$0xff] %v2485_v22  ;;  %v2486_v51 = vadd.f32 %v4280_v47, %v2366_v41 }
 0x6b6   :  { %2520 = vst [vmem:[#allocation11 + $0x38] sm:$0xff] %v2488_v53 }
 0x6b7   :  { %2518 = vst [vmem:[#allocation11 + $0x28] sm:$0xff] %v2486_v51 }
 0x6c1   :  { %v3409_v52 = vpop.f32.mrb[72].mxu1 }
 0x6c2   :  { %v2491_v1 = vadd.f32 %v3409_v52, %v4280_v47  ;;  %v2379_v2 = vpop.f32.mrb[73].mxu1 }
 0x6c3   :  { %v2489_v3 = vadd.f32 %v4280_v47, %v2379_v2  ;;  %v3410_v4 = vpop.f32.mrb[74].mxu1 }
 0x6c4   :  { %2523 = vst [vmem:[#allocation11 + $0x50] sm:$0xff] %v2491_v1  ;;  %v2492_v5 = vadd.f32 %v3410_v4, %v4280_v47  ;;  %v2382_v0 = vpop.f32.mrb[75].mxu1 }
 0x6c5   :  { %2521 = vst [vmem:[#allocation11 + $0x40] sm:$0xff] %v2489_v3  ;;  %v2490_v6 = vadd.f32 %v4280_v47, %v2382_v0 }
 0x6c6   :  { %2524 = vst [vmem:[#allocation11 + $0x58] sm:$0xff] %v2492_v5 }
 0x6c7   :  { %2522 = vst [vmem:[#allocation11 + $0x48] sm:$0xff] %v2490_v6 }
 0x6d1   :  { %v3413_v7 = vpop.f32.mrb[76].mxu1 }
 0x6d2   :  { %v2495_v58 = vadd.f32 %v3413_v7, %v4280_v47  ;;  %v2395_v8 = vpop.f32.mrb[77].mxu1 }
 0x6d3   :  { %v2493_v55 = vadd.f32 %v4280_v47, %v2395_v8  ;;  %v3414_v10 = vpop.f32.mrb[78].mxu1 }
 0x6d4   :  { %2527 = vst [vmem:[#allocation11 + $0x70] sm:$0xff] %v2495_v58  ;;  %v2496_v12 = vadd.f32 %v3414_v10, %v4280_v47  ;;  %v2398_v54 = vpop.f32.mrb[79].mxu1 }
 0x6d5   :  { %2525 = vst [vmem:[#allocation11 + $0x60] sm:$0xff] %v2493_v55  ;;  %v2494_v17 = vadd.f32 %v4280_v47, %v2398_v54 }
 0x6d6   :  { %2528 = vst [vmem:[#allocation11 + $0x78] sm:$0xff] %v2496_v12 }
 0x6d7   :  { %2526 = vst [vmem:[#allocation11 + $0x68] sm:$0xff] %v2494_v17 }
 0x6e1   :  { %v3417_v11 = vpop.f32.mrb[80].mxu1 }
 0x6e2   :  { %v2499_v18 = vadd.f32 %v3417_v11, %v4280_v47  ;;  %v2411_v19 = vpop.f32.mrb[81].mxu1 }
 0x6e3   :  { %v2497_v20 = vadd.f32 %v4280_v47, %v2411_v19  ;;  %v3418_v16 = vpop.f32.mrb[82].mxu1 }
 0x6e4   :  { %2531 = vst [vmem:[#allocation11 + $0x90] sm:$0xff] %v2499_v18  ;;  %v2500_v21 = vadd.f32 %v3418_v16, %v4280_v47  ;;  %v2414_v25 = vpop.f32.mrb[83].mxu1 }
 0x6e5   :  { %2529 = vst [vmem:[#allocation11 + $0x80] sm:$0xff] %v2497_v20  ;;  %v2498_v15 = vadd.f32 %v4280_v47, %v2414_v25 }
 0x6e6   :  { %2532 = vst [vmem:[#allocation11 + $0x98] sm:$0xff] %v2500_v21 }
 0x6e7   :  { %2530 = vst [vmem:[#allocation11 + $0x88] sm:$0xff] %v2498_v15 }
 0x6f1   :  { %v3421_v27 = vpop.f32.mrb[84].mxu1 }
 0x6f2   :  { %v2503_v14 = vadd.f32 %v3421_v27, %v4280_v47  ;;  %v2427_v29 = vpop.f32.mrb[85].mxu1 }
 0x6f3   :  { %v2501_v23 = vadd.f32 %v4280_v47, %v2427_v29  ;;  %v3422_v13 = vpop.f32.mrb[86].mxu1 }
 0x6f4   :  { %2535 = vst [vmem:[#allocation11 + $0xb0] sm:$0xff] %v2503_v14  ;;  %v2504_v28 = vadd.f32 %v3422_v13, %v4280_v47  ;;  %v2430_v30 = vpop.f32.mrb[87].mxu1 }
 0x6f5   :  { %2533 = vst [vmem:[#allocation11 + $0xa0] sm:$0xff] %v2501_v23  ;;  %v2502_v34 = vadd.f32 %v4280_v47, %v2430_v30 }
 0x6f6   :  { %2536 = vst [vmem:[#allocation11 + $0xb8] sm:$0xff] %v2504_v28 }
 0x6f7   :  { %2534 = vst [vmem:[#allocation11 + $0xa8] sm:$0xff] %v2502_v34 }
 0x701   :  { %v3425_v32 = vpop.f32.mrb[88].mxu1 }
 0x702   :  { %v2507_v26 = vadd.f32 %v3425_v32, %v4280_v47  ;;  %v2443_v24 = vpop.f32.mrb[89].mxu1 }
 0x703   :  { %v2505_v36 = vadd.f32 %v4280_v47, %v2443_v24  ;;  %v3426_v9 = vpop.f32.mrb[90].mxu1 }
 0x704   :  { %2539 = vst [vmem:[#allocation11 + $0xd0] sm:$0xff] %v2507_v26  ;;  %v2508_v38 = vadd.f32 %v3426_v9, %v4280_v47  ;;  %v2446_v31 = vpop.f32.mrb[91].mxu1 }
 0x705   :  { %2537 = vst [vmem:[#allocation11 + $0xc0] sm:$0xff] %v2505_v36  ;;  %v2506_v40 = vadd.f32 %v4280_v47, %v2446_v31 }
 0x706   :  { %2540 = vst [vmem:[#allocation11 + $0xd8] sm:$0xff] %v2508_v38 }
 0x707   :  { %2538 = vst [vmem:[#allocation11 + $0xc8] sm:$0xff] %v2506_v40 }
 0x711   :  { %v3429_v42 = vpop.f32.mrb[92].mxu1 }
 0x712   :  { %v2511_v39 = vadd.f32 %v3429_v42, %v4280_v47  ;;  %v2459_v33 = vpop.f32.mrb[93].mxu1 }
 0x713   :  { %v2509_v43 = vadd.f32 %v4280_v47, %v2459_v33  ;;  %v3430_v44 = vpop.f32.mrb[94].mxu1 }
 0x714   :  { %2543 = vst [vmem:[#allocation11 + $0xf0] sm:$0xff] %v2511_v39  ;;  %v2512_v45 = vadd.f32 %v3430_v44, %v4280_v47  ;;  %v2462_v46 = vpop.f32.mrb[95].mxu1 }
 0x715   :  { %2541 = vst [vmem:[#allocation11 + $0xe0] sm:$0xff] %v2509_v43  ;;  %v2510_v48 = vadd.f32 %v4280_v47, %v2462_v46 }
 0x716   :  { %2544 = vst [vmem:[#allocation11 + $0xf8] sm:$0xff] %v2512_v45 }
 0x717   :  { %2542 = vst [vmem:[#allocation11 + $0xe8] sm:$0xff] %v2510_v48 }
 0x718   :  { %3802 = shalt.err (!%p3799_p2)
}
 0x719   :  { %s3803_s28 = scalar_lea.hbm %s4337_s8, 4096 }
 0x71a   :  { %p3804_p3 = scmp.ne.s32.totalorder %s4337_s8, %s3803_s28  ;;  %p3807_p4 = scmp.lt.u32.totalorder %s3803_s28, %s4337_s8 }
 0x71c   :  { %p3809_p5 = pnand %p3807_p4, %p3804_p3 }
 0x71e   :  { %3812 = shalt.err (!%p3809_p5)
}
 0x71f   :  { %2556 = dma.vmem_to_hbm [thread:$0]  %s2551_s27, 4096, %s4337_s8, [#allocation4], %s3826_s4, %s3826_s4, %s3827_s20  }
 0x720   :  { %3819 = dma.done.wait [#allocation4], 4096  }
 0x721   :  { %3820 = vsyncadd [#allocation4], 4294963200 }
 0x722   :  { %2560 = vsyncpa [#allocation3], 1 }
 0x723   :  { %2561 = vsyncpa [#allocation6], 1 }
 0x724   :  { %2562 = vsyncpa [#allocation9], 1 }
 0x725   :  { %2563 = vsyncpa [#allocation4], 1 }

</bundles_post_ra>
